<compile_context>
chip_gen: v7x
topology: tpu7x:2x2x1
jax: 0.10.0
libtpu: 0.0.40
codegen_flags: <defaults>
</compile_context>

<pallas_src>
import functools
import math

import jax
import jax.numpy as jnp
from jax import lax
from jax.experimental import pallas as pl
from jax.experimental.pallas import tpu as pltpu


def _symmetric_loss_kernel(x1_ref, x2_hbm, labels_ref, o_ref,
                           x2_stage, x2n_ref, col_shift_ref, col_sum_ref,
                           col_labsum_ref, dot_col_ref, row_acc_ref,
                           *, t_exp, norm, eps, single_pass, n_valid,
                           needs_mask, mxu_dtype):
    pid = pl.program_id(0)
    tm = labels_ref.shape[0]

    @pl.when(pid == 0)
    def _init():
        # One-time: stage x2 with a single DMA (no double buffering),
        # normalize it and cast to the MXU operand dtype into a persistent
        # VMEM scratch reused by every tile.
        pltpu.sync_copy(x2_hbm, x2_stage)
        x2 = x2_stage[...].astype(jnp.float32)
        if norm:
            s2 = lax.rsqrt(jnp.maximum(jnp.sum(x2 * x2, axis=1, keepdims=True),
                                       eps * eps))
            x2 = x2 * s2
        x2n_ref[...] = x2.astype(mxu_dtype)
        col_sum_ref[...] = jnp.zeros_like(col_sum_ref)
        col_labsum_ref[...] = jnp.zeros_like(col_labsum_ref)
        dot_col_ref[...] = jnp.zeros_like(dot_col_ref)
        row_acc_ref[...] = jnp.zeros_like(row_acc_ref)
        if not single_pass:
            col_shift_ref[...] = jnp.full_like(col_shift_ref, -jnp.inf)

    x1 = x1_ref[...].astype(jnp.float32)          # (TM, D)
    labels = labels_ref[...].astype(jnp.float32)  # (TM, N)

    if norm:
        # F.normalize(x, p=2, dim=1) == x * rsqrt(max(sum(x^2), eps^2)).
        # Fold exp(t) into x1's scale (saves an N^2 multiply).
        s1 = t_exp * lax.rsqrt(jnp.maximum(jnp.sum(x1 * x1, axis=1, keepdims=True),
                                           eps * eps))
        x1 = x1 * s1
    else:
        x1 = x1 * t_exp

    # logits tile = x1 @ x2.T on the MXU (bf16 operands when safe, f32 acc).
    logits = lax.dot_general(x1.astype(mxu_dtype), x2n_ref[...],
                             (((1,), (1,)), ((), ())),
                             preferred_element_type=jnp.float32)   # (TM, N)

    row_labsum = jnp.sum(labels, axis=1, keepdims=True)            # (TM, 1)
    # Lane-partial accumulators: per-tile reductions stay sublane-only, the
    # single cross-lane collapse happens once in the finalize step.
    dot_col_ref[...] += jnp.sum(labels * logits, axis=0, keepdims=True)
    col_labsum_ref[...] += jnp.sum(labels, axis=0, keepdims=True)

    if needs_mask:
        # Rows were padded to a multiple of TM: padded labels are zero, only
        # the column exp sums need explicit masking.
        row_ids = pid * tm + lax.broadcasted_iota(jnp.int32, (tm, 1), 0)
        valid = (row_ids < n_valid).astype(jnp.float32)             # (TM, 1)
    else:
        valid = None

    if single_pass:
        # norm=True bounds |logits| <= exp(t): use the STATIC shift t_exp.
        # No runtime tile max, no shift bookkeeping, one exp pass per tile.
        e = jnp.exp(logits - t_exp)                                 # (TM, N)
        row_lse = jnp.log(jnp.sum(e, axis=1, keepdims=True)) + t_exp
        e_col = e if valid is None else e * valid
        col_sum_ref[...] += jnp.sum(e_col, axis=0, keepdims=True)
    else:
        # Numerically robust two-pass variant (norm=False or large t).
        row_max = jnp.max(logits, axis=1, keepdims=True)
        row_lse = (jnp.log(jnp.sum(jnp.exp(logits - row_max), axis=1,
                                   keepdims=True)) + row_max)
        old_shift = col_shift_ref[...]                              # (1, N)
        new_shift = jnp.maximum(old_shift,
                                jnp.max(logits, axis=0, keepdims=True))
        e_c = jnp.exp(logits - new_shift)
        if valid is not None:
            e_c = e_c * valid
        col_sum_ref[...] = (col_sum_ref[...] * jnp.exp(old_shift - new_shift)
                            + jnp.sum(e_c, axis=0, keepdims=True))
        col_shift_ref[...] = new_shift

    # Row-side partial of the algebraic loss form (small sublane reduce).
    row_acc_ref[...] += jnp.sum(row_lse * row_labsum)

    @pl.when(pid == pl.num_programs(0) - 1)
    def _finalize():
        shift = t_exp if single_pass else col_shift_ref[...]
        col_lse = jnp.log(col_sum_ref[...]) + shift                 # (1, N)
        col_term = jnp.sum(col_lse * col_labsum_ref[...])
        dot_total = jnp.sum(dot_col_ref[...])
        # loss = -(1/2N) [ 2*sum(L*Z) - sum_i rlse_i*rlab_i - sum_j clse_j*clab_j ]
        total = 2.0 * dot_total - row_acc_ref[...] - col_term       # (1, 1)
        o_ref[...] = -total * (1.0 / (2.0 * n_valid))


def _derive_tiling(n, d, lab_itemsize, x1_itemsize, x2_itemsize, mxu_itemsize,
                   block_rows=None):
    """VMEM-budget-driven row-tile size + vmem limit (generation-aware)."""
    try:
        cap = int(pltpu.get_tpu_info().vmem_capacity_bytes)
    except Exception:
        cap = 64 << 20                     # v7x per-core VMEM (smallest gen)
    # Resident footprint: x2 staging + normalized x2 + (1,N) column scratches.
    fixed = n * d * (x2_itemsize + mxu_itemsize) + 6 * 4 * max(n, 128) + (2 << 20)
    # Per-row cost: labels double-buffer stream + x1 double buffer + ~3 (TM,N)
    # f32 temporaries (logits, exp, upcast labels).
    per_row = n * (2 * lab_itemsize + 12) + 2 * d * x1_itemsize
    if block_rows is None:
        budget = int(cap * 0.70)
        tm = max((budget - fixed) // per_row, 8)
        if tm >= 512:
            tm = min(tm - tm % 256, 1024)  # match 256-wide MXU, cap step count
        elif tm >= 256:
            tm = 256
        elif tm >= 128:
            tm = 128
        else:
            tm = max(8, tm - tm % 8)
    else:
        tm = max(8, (int(block_rows) // 8) * 8)
    tm = int(min(tm, ((n + 7) // 8) * 8))
    vmem_limit = int(min(int(cap * 0.9),
                         max(32 << 20, fixed + per_row * tm + (8 << 20))))
    return tm, vmem_limit


def symmetric_loss(input1, input2, labels, *, t: float = 1.0, norm: bool = True,
                   block_rows: int | None = None, mxu_bf16: bool | None = None):
    """Pallas TPU implementation of SymmetricLoss.forward. Returns scalar f32."""
    assert input1.ndim == 2 and input2.ndim == 2 and labels.ndim == 2
    assert input1.shape == input2.shape
    N, D = input1.shape
    assert labels.shape == (N, N)

    # TODO(synk): t is a static Python float here (the PyTorch module bakes
    # exp(t) at construction). If t must be a traced/learned tensor (or a
    # backward pass is needed), pass exp(t) as an SMEM scalar operand and add
    # a custom_vjp; forward-only here.
    t_exp = float(math.exp(t))
    # Static-shift single-exp-pass is safe only while exp(logits - exp(t))
    # cannot underflow a whole row (logits dynamic range <= 2*exp(t)).
    single_pass = bool(norm) and (2.0 * t_exp < 60.0)
    if mxu_bf16 is None:
        mxu_bf16 = bool(norm)   # bounded cosine-sim logits tolerate bf16 MXU
    mxu_dtype = jnp.bfloat16 if mxu_bf16 else jnp.float32

    tm, vmem_limit = _derive_tiling(
        N, D, labels.dtype.itemsize, input1.dtype.itemsize,
        input2.dtype.itemsize, jnp.dtype(mxu_dtype).itemsize,
        block_rows=block_rows)

    n_tiles = -(-N // tm)
    n_padded = n_tiles * tm
    pad = n_padded - N
    x1p = input1 if pad == 0 else jnp.pad(input1, ((0, pad), (0, 0)))
    labp = labels if pad == 0 else jnp.pad(labels, ((0, pad), (0, 0)))

    kernel = functools.partial(
        _symmetric_loss_kernel,
        t_exp=t_exp, norm=norm, eps=1e-12, single_pass=single_pass,
        n_valid=N, needs_mask=(pad != 0), mxu_dtype=mxu_dtype)

    n_exp = 1 if single_pass else 2
    cost = pl.CostEstimate(
        flops=2 * n_padded * N * D + 10 * n_padded * N,
        transcendentals=n_exp * n_padded * N + 2 * N,
        bytes_accessed=(labels.size * labels.dtype.itemsize
                        + input1.size * input1.dtype.itemsize
                        + input2.size * input2.dtype.itemsize + 4))

    # TODO(synk): on v7x the row-tile axis could be split across the two
    # TensorCores (per-core column partials + a tiny O(N) combine); kept
    # single-core here since this axis carries the online column accumulators.
    out = pl.pallas_call(
        kernel,
        out_shape=jax.ShapeDtypeStruct((1, 1), jnp.float32),
        grid_spec=pltpu.PrefetchScalarGridSpec(
            num_scalar_prefetch=0,
            grid=(n_tiles,),
            in_specs=[
                pl.BlockSpec((tm, D), lambda i: (i, 0)),    # x1 row tile
                pl.BlockSpec(memory_space=pl.ANY),          # x2: DMA'd once
                pl.BlockSpec((tm, N), lambda i: (i, 0)),    # labels row tile
            ],
            out_specs=pl.BlockSpec((1, 1), lambda i: (0, 0)),
            scratch_shapes=[
                pltpu.VMEM((N, D), input2.dtype),    # x2 staging (1 buffer)
                pltpu.VMEM((N, D), mxu_dtype),       # normalized x2 (MXU operand)
                pltpu.VMEM((1, N), jnp.float32),     # column shift (two-pass only)
                pltpu.VMEM((1, N), jnp.float32),     # running column sum(exp)
                pltpu.VMEM((1, N), jnp.float32),     # column label sums
                pltpu.VMEM((1, N), jnp.float32),     # lane-partial sum(labels*logits)
                pltpu.VMEM((1, 1), jnp.float32),     # row-term scalar accumulator
            ],
        ),
        compiler_params=pltpu.CompilerParams(
            dimension_semantics=("arbitrary",),
            vmem_limit_bytes=vmem_limit,
        ),
        cost_estimate=cost,
    )(x1p, input2, labp)
    return out[0, 0]


def _reference(input1, input2, labels, *, t: float = 1.0, norm: bool = True):
    """Pure-JAX reference matching the PyTorch module."""
    x1 = input1.astype(jnp.float32)
    x2 = input2.astype(jnp.float32)
    if norm:
        x1 = x1 / jnp.maximum(jnp.linalg.norm(x1, axis=1, keepdims=True), 1e-12)
        x2 = x2 / jnp.maximum(jnp.linalg.norm(x2, axis=1, keepdims=True), 1e-12)
    logits = (x1 @ x2.T) * jnp.exp(jnp.float32(t))
    lab = labels.astype(jnp.float32)

    def soft_ce(lg, lb):
        logp = jax.nn.log_softmax(lg, axis=1)
        return -jnp.mean(jnp.sum(lb * logp, axis=1))

    return (soft_ce(logits, lab) + soft_ce(logits.T, lab.T)) / 2.0


if __name__ == "__main__":
    key = jax.random.PRNGKey(0)
    k1, k2, k3, k4, k5, k6 = jax.random.split(key, 6)

    N, D = 256, 32
    input1 = jax.random.normal(k1, (N, D), dtype=jnp.float32)
    input2 = jax.random.normal(k2, (N, D), dtype=jnp.float32)
    # Soft targets (N, N): row-stochastic, as expected by cross_entropy with
    # probability targets (the module transposes `labels`, so it must be 2-D).
    labels = jax.nn.softmax(jax.random.normal(k3, (N, N), dtype=jnp.float32),
                            axis=1)

    # Case 1: norm=True -> static-shift single-exp-pass + bf16 MXU operands.
    loss = symmetric_loss(input1, input2, labels, t=1.0, norm=True,
                          block_rows=64)
    loss = jax.block_until_ready(loss)
    ref = _reference(input1, input2, labels, t=1.0, norm=True)
    assert jnp.allclose(loss, ref, atol=3e-2, rtol=2e-3), (loss, ref)

    # Case 2: norm=False -> numerically-safe two-pass path, f32 MXU operands.
    loss2 = symmetric_loss(input1, input2, labels, t=0.5, norm=False,
                           block_rows=128)
    loss2 = jax.block_until_ready(loss2)
    ref2 = _reference(input1, input2, labels, t=0.5, norm=False)
    assert jnp.allclose(loss2, ref2, atol=5e-4, rtol=2e-5), (loss2, ref2)

    # Case 3: N not a multiple of the tile -> padded rows + in-kernel masking.
    N3 = 200
    a1 = jax.random.normal(k4, (N3, D), dtype=jnp.float32)
    a2 = jax.random.normal(k5, (N3, D), dtype=jnp.float32)
    lab3 = jax.nn.softmax(jax.random.normal(k6, (N3, N3), dtype=jnp.float32),
                          axis=1)
    loss3 = symmetric_loss(a1, a2, lab3, t=1.0, norm=True, block_rows=64)
    loss3 = jax.block_until_ready(loss3)
    ref3 = _reference(a1, a2, lab3, t=1.0, norm=True)
    assert jnp.allclose(loss3, ref3, atol=3e-2, rtol=2e-3), (loss3, ref3)

    print("KERNEL_OK")
</pallas_src>

<mosaic_0001>
module attributes {stable_mosaic.version = 11 : i64} {
  func.func @_symmetric_loss_kernel(%arg0: i32, %arg1: memref<64x32xf32, #tpu.memory_space<vmem>>, %arg2: memref<256x32xf32, #tpu.memory_space<any>>, %arg3: memref<64x256xf32, #tpu.memory_space<vmem>>, %arg4: memref<1x1xf32, #tpu.memory_space<vmem>>, %arg5: memref<256x32xf32, #tpu.memory_space<vmem>>, %arg6: memref<256x32xbf16, #tpu.memory_space<vmem>>, %arg7: memref<1x256xf32, #tpu.memory_space<vmem>>, %arg8: memref<1x256xf32, #tpu.memory_space<vmem>>, %arg9: memref<1x256xf32, #tpu.memory_space<vmem>>, %arg10: memref<1x256xf32, #tpu.memory_space<vmem>>, %arg11: memref<1x1xf32, #tpu.memory_space<vmem>>) attributes {dimension_semantics = [#tpu.dimension_semantics<arbitrary>], iteration_bounds = array<i64: 4>, scalar_prefetch = 0 : i64, scratch_operands = 7 : i64, tpu.core_type = #tpu.core_type<tc>, window_params = [{transform_indices = @transform_0, window_bounds = array<i64: 64, 32>}, {}, {transform_indices = @transform_2, window_bounds = array<i64: 64, 256>}, {pipeline_mode = #tpu.pipeline_mode<synchronous>, transform_indices = @transform_3, window_bounds = array<i64: 1, 1>}]} {
    %c0_i32 = arith.constant 0 : i32
    %0 = arith.cmpi eq, %arg0, %c0_i32 : i32
    %1 = arith.extui %0 : i1 to i32
    %c0_i32_0 = arith.constant 0 : i32
    %2 = arith.cmpi ne, %1, %c0_i32_0 : i32
    scf.if %2 {
      "tpu.region"() ({
        %75 = tpu.sem_alloc : memref<!tpu.dma_semaphore, #tpu.memory_space<semaphore_mem>>
        tpu.enqueue_dma source(%arg2 : memref<256x32xf32, #tpu.memory_space<any>>) target(%arg5 : memref<256x32xf32, #tpu.memory_space<vmem>>) target_semaphore(%75 : memref<!tpu.dma_semaphore, #tpu.memory_space<semaphore_mem>>)
        tpu.wait_dma2 semaphore(%75 : memref<!tpu.dma_semaphore, #tpu.memory_space<semaphore_mem>>) src(%arg2 : memref<256x32xf32, #tpu.memory_space<any>>) dst(%arg5 : memref<256x32xf32, #tpu.memory_space<vmem>>)
        tpu.yield
      }) : () -> ()
      %c0_34 = arith.constant 0 : index
      %c0_35 = arith.constant 0 : index
      %56 = vector.load %arg5[%c0_34, %c0_35] : memref<256x32xf32, #tpu.memory_space<vmem>>, vector<256x32xf32>
      %57 = arith.mulf %56, %56 : vector<256x32xf32>
      %cst_36 = arith.constant dense<0.000000e+00> : vector<256xf32>
      %58 = vector.multi_reduction <add>, %57, %cst_36 [1] : vector<256x32xf32> to vector<256xf32>
      %59 = vector.shape_cast %58 : vector<256xf32> to vector<256x1xf32>
      %cst_37 = arith.constant 1.000000e-24 : f32
      %60 = vector.broadcast %cst_37 : f32 to vector<256x1xf32>
      %61 = arith.maximumf %59, %60 : vector<256x1xf32>
      %62 = math.rsqrt %61 : vector<256x1xf32>
      %63 = vector.broadcast %62 : vector<256x1xf32> to vector<256x32xf32>
      %64 = arith.mulf %56, %63 : vector<256x32xf32>
      %65 = arith.truncf %64 : vector<256x32xf32> to vector<256x32xbf16>
      %c0_38 = arith.constant 0 : index
      %c0_39 = arith.constant 0 : index
      %66 = vector.load %arg6[%c0_38, %c0_39] : memref<256x32xbf16, #tpu.memory_space<vmem>>, vector<256x32xbf16>
      tpu.vector_store %arg6[%c0_38, %c0_39], %65 {strides = array<i32>} : memref<256x32xbf16, #tpu.memory_space<vmem>>, vector<256x32xbf16>,
      %cst_40 = arith.constant 0.000000e+00 : f32
      %67 = vector.broadcast %cst_40 : f32 to vector<1x256xf32>
      %c0_41 = arith.constant 0 : index
      %c0_42 = arith.constant 0 : index
      %68 = vector.load %arg8[%c0_41, %c0_42] : memref<1x256xf32, #tpu.memory_space<vmem>>, vector<1x256xf32>
      tpu.vector_store %arg8[%c0_41, %c0_42], %67 {strides = array<i32>} : memref<1x256xf32, #tpu.memory_space<vmem>>, vector<1x256xf32>,
      %cst_43 = arith.constant 0.000000e+00 : f32
      %69 = vector.broadcast %cst_43 : f32 to vector<1x256xf32>
      %c0_44 = arith.constant 0 : index
      %c0_45 = arith.constant 0 : index
      %70 = vector.load %arg9[%c0_44, %c0_45] : memref<1x256xf32, #tpu.memory_space<vmem>>, vector<1x256xf32>
      tpu.vector_store %arg9[%c0_44, %c0_45], %69 {strides = array<i32>} : memref<1x256xf32, #tpu.memory_space<vmem>>, vector<1x256xf32>,
      %cst_46 = arith.constant 0.000000e+00 : f32
      %71 = vector.broadcast %cst_46 : f32 to vector<1x256xf32>
      %c0_47 = arith.constant 0 : index
      %c0_48 = arith.constant 0 : index
      %72 = vector.load %arg10[%c0_47, %c0_48] : memref<1x256xf32, #tpu.memory_space<vmem>>, vector<1x256xf32>
      tpu.vector_store %arg10[%c0_47, %c0_48], %71 {strides = array<i32>} : memref<1x256xf32, #tpu.memory_space<vmem>>, vector<1x256xf32>,
      %cst_49 = arith.constant 0.000000e+00 : f32
      %73 = vector.broadcast %cst_49 : f32 to vector<1x1xf32>
      %c0_50 = arith.constant 0 : index
      %c0_51 = arith.constant 0 : index
      %74 = vector.load %arg11[%c0_50, %c0_51] : memref<1x1xf32, #tpu.memory_space<vmem>>, vector<1x1xf32>
      tpu.vector_store %arg11[%c0_50, %c0_51], %73 {strides = array<i32>} : memref<1x1xf32, #tpu.memory_space<vmem>>, vector<1x1xf32>,
    } else {
    }
    %c0 = arith.constant 0 : index
    %c0_1 = arith.constant 0 : index
    %3 = vector.load %arg1[%c0, %c0_1] : memref<64x32xf32, #tpu.memory_space<vmem>>, vector<64x32xf32>
    %c0_2 = arith.constant 0 : index
    %c0_3 = arith.constant 0 : index
    %4 = vector.load %arg3[%c0_2, %c0_3] : memref<64x256xf32, #tpu.memory_space<vmem>>, vector<64x256xf32>
    %5 = arith.mulf %3, %3 : vector<64x32xf32>
    %cst = arith.constant dense<0.000000e+00> : vector<64xf32>
    %6 = vector.multi_reduction <add>, %5, %cst [1] : vector<64x32xf32> to vector<64xf32>
    %7 = vector.shape_cast %6 : vector<64xf32> to vector<64x1xf32>
    %cst_4 = arith.constant 1.000000e-24 : f32
    %8 = vector.broadcast %cst_4 : f32 to vector<64x1xf32>
    %9 = arith.maximumf %7, %8 : vector<64x1xf32>
    %10 = math.rsqrt %9 : vector<64x1xf32>
    %cst_5 = arith.constant 2.71828175 : f32
    %11 = vector.broadcast %cst_5 : f32 to vector<64x1xf32>
    %12 = arith.mulf %11, %10 : vector<64x1xf32>
    %13 = vector.broadcast %12 : vector<64x1xf32> to vector<64x32xf32>
    %14 = arith.mulf %3, %13 : vector<64x32xf32>
    %15 = arith.truncf %14 : vector<64x32xf32> to vector<64x32xbf16>
    %c0_6 = arith.constant 0 : index
    %c0_7 = arith.constant 0 : index
    %16 = vector.load %arg6[%c0_6, %c0_7] : memref<256x32xbf16, #tpu.memory_space<vmem>>, vector<256x32xbf16>
    %cst_8 = arith.constant dense<0.000000e+00> : vector<64x256xf32>
    %17 = tpu.matmul %15, %16, %cst_8 {dimension_numbers = #tpu.dot_dimension_numbers<[1], [1], [0], [0], [0, 0, 1, 0], [], []>} : vector<64x32xbf16>, vector<256x32xbf16>, vector<64x256xf32> -> vector<64x256xf32>
    %cst_9 = arith.constant dense<0.000000e+00> : vector<64xf32>
    %18 = vector.multi_reduction <add>, %4, %cst_9 [1] : vector<64x256xf32> to vector<64xf32>
    %19 = vector.shape_cast %18 : vector<64xf32> to vector<64x1xf32>
    %c0_10 = arith.constant 0 : index
    %c0_11 = arith.constant 0 : index
    %20 = vector.load %arg10[%c0_10, %c0_11] : memref<1x256xf32, #tpu.memory_space<vmem>>, vector<1x256xf32>
    %21 = arith.mulf %4, %17 : vector<64x256xf32>
    %cst_12 = arith.constant dense<0.000000e+00> : vector<256xf32>
    %22 = vector.multi_reduction <add>, %21, %cst_12 [0] : vector<64x256xf32> to vector<256xf32>
    %23 = vector.shape_cast %22 : vector<256xf32> to vector<1x256xf32>
    %24 = arith.addf %20, %23 : vector<1x256xf32>
    %c0_13 = arith.constant 0 : index
    %c0_14 = arith.constant 0 : index
    %25 = vector.load %arg10[%c0_13, %c0_14] : memref<1x256xf32, #tpu.memory_space<vmem>>, vector<1x256xf32>
    tpu.vector_store %arg10[%c0_13, %c0_14], %24 {strides = array<i32>} : memref<1x256xf32, #tpu.memory_space<vmem>>, vector<1x256xf32>,
    %c0_15 = arith.constant 0 : index
    %c0_16 = arith.constant 0 : index
    %26 = vector.load %arg9[%c0_15, %c0_16] : memref<1x256xf32, #tpu.memory_space<vmem>>, vector<1x256xf32>
    %cst_17 = arith.constant dense<0.000000e+00> : vector<256xf32>
    %27 = vector.multi_reduction <add>, %4, %cst_17 [0] : vector<64x256xf32> to vector<256xf32>
    %28 = vector.shape_cast %27 : vector<256xf32> to vector<1x256xf32>
    %29 = arith.addf %26, %28 : vector<1x256xf32>
    %c0_18 = arith.constant 0 : index
    %c0_19 = arith.constant 0 : index
    %30 = vector.load %arg9[%c0_18, %c0_19] : memref<1x256xf32, #tpu.memory_space<vmem>>, vector<1x256xf32>
    tpu.vector_store %arg9[%c0_18, %c0_19], %29 {strides = array<i32>} : memref<1x256xf32, #tpu.memory_space<vmem>>, vector<1x256xf32>,
    %cst_20 = arith.constant 2.71828175 : f32
    %31 = vector.broadcast %cst_20 : f32 to vector<64x256xf32>
    %32 = arith.subf %17, %31 : vector<64x256xf32>
    %33 = math.exp %32 : vector<64x256xf32>
    %cst_21 = arith.constant dense<0.000000e+00> : vector<64xf32>
    %34 = vector.multi_reduction <add>, %33, %cst_21 [1] : vector<64x256xf32> to vector<64xf32>
    %35 = vector.shape_cast %34 : vector<64xf32> to vector<64x1xf32>
    %36 = math.log %35 : vector<64x1xf32>
    %cst_22 = arith.constant 2.71828175 : f32
    %37 = vector.broadcast %cst_22 : f32 to vector<64x1xf32>
    %38 = arith.addf %36, %37 : vector<64x1xf32>
    %c0_23 = arith.constant 0 : index
    %c0_24 = arith.constant 0 : index
    %39 = vector.load %arg8[%c0_23, %c0_24] : memref<1x256xf32, #tpu.memory_space<vmem>>, vector<1x256xf32>
    %cst_25 = arith.constant dense<0.000000e+00> : vector<256xf32>
    %40 = vector.multi_reduction <add>, %33, %cst_25 [0] : vector<64x256xf32> to vector<256xf32>
    %41 = vector.shape_cast %40 : vector<256xf32> to vector<1x256xf32>
    %42 = arith.addf %39, %41 : vector<1x256xf32>
    %c0_26 = arith.constant 0 : index
    %c0_27 = arith.constant 0 : index
    %43 = vector.load %arg8[%c0_26, %c0_27] : memref<1x256xf32, #tpu.memory_space<vmem>>, vector<1x256xf32>
    tpu.vector_store %arg8[%c0_26, %c0_27], %42 {strides = array<i32>} : memref<1x256xf32, #tpu.memory_space<vmem>>, vector<1x256xf32>,
    %c0_28 = arith.constant 0 : index
    %c0_29 = arith.constant 0 : index
    %44 = vector.load %arg11[%c0_28, %c0_29] : memref<1x1xf32, #tpu.memory_space<vmem>>, vector<1x1xf32>
    %45 = arith.mulf %38, %19 : vector<64x1xf32>
    %46 = vector.shape_cast %45 : vector<64x1xf32> to vector<1x64x1xf32>
    %cst_30 = arith.constant dense<0.000000e+00> : vector<1xf32>
    %47 = vector.multi_reduction <add>, %46, %cst_30 [1, 2] : vector<1x64x1xf32> to vector<1xf32>
    %48 = vector.shape_cast %47 : vector<1xf32> to vector<1x1x1xf32>
    %49 = vector.extract %48[0, 0, 0] : f32 from vector<1x1x1xf32>
    %50 = vector.broadcast %49 : f32 to vector<1x1xf32>
    %51 = arith.addf %44, %50 : vector<1x1xf32>
    %c0_31 = arith.constant 0 : index
    %c0_32 = arith.constant 0 : index
    %52 = vector.load %arg11[%c0_31, %c0_32] : memref<1x1xf32, #tpu.memory_space<vmem>>, vector<1x1xf32>
    tpu.vector_store %arg11[%c0_31, %c0_32], %51 {strides = array<i32>} : memref<1x1xf32, #tpu.memory_space<vmem>>, vector<1x1xf32>,
    %c3_i32 = arith.constant 3 : i32
    %53 = arith.cmpi eq, %arg0, %c3_i32 : i32
    %54 = arith.extui %53 : i1 to i32
    %c0_i32_33 = arith.constant 0 : i32
    %55 = arith.cmpi ne, %54, %c0_i32_33 : i32
    scf.if %55 {
      %c0_34 = arith.constant 0 : index
      %c0_35 = arith.constant 0 : index
      %56 = vector.load %arg8[%c0_34, %c0_35] : memref<1x256xf32, #tpu.memory_space<vmem>>, vector<1x256xf32>
      %57 = math.log %56 : vector<1x256xf32>
      %cst_36 = arith.constant 2.71828175 : f32
      %58 = vector.broadcast %cst_36 : f32 to vector<1x256xf32>
      %59 = arith.addf %57, %58 : vector<1x256xf32>
      %c0_37 = arith.constant 0 : index
      %c0_38 = arith.constant 0 : index
      %60 = vector.load %arg9[%c0_37, %c0_38] : memref<1x256xf32, #tpu.memory_space<vmem>>, vector<1x256xf32>
      %61 = arith.mulf %59, %60 : vector<1x256xf32>
      %62 = vector.shape_cast %61 : vector<1x256xf32> to vector<1x1x256xf32>
      %cst_39 = arith.constant dense<0.000000e+00> : vector<1xf32>
      %63 = vector.multi_reduction <add>, %62, %cst_39 [1, 2] : vector<1x1x256xf32> to vector<1xf32>
      %64 = vector.shape_cast %63 : vector<1xf32> to vector<1x1x1xf32>
      %65 = vector.extract %64[0, 0, 0] : f32 from vector<1x1x1xf32>
      %c0_40 = arith.constant 0 : index
      %c0_41 = arith.constant 0 : index
      %66 = vector.load %arg10[%c0_40, %c0_41] : memref<1x256xf32, #tpu.memory_space<vmem>>, vector<1x256xf32>
      %67 = vector.shape_cast %66 : vector<1x256xf32> to vector<1x1x256xf32>
      %cst_42 = arith.constant dense<0.000000e+00> : vector<1xf32>
      %68 = vector.multi_reduction <add>, %67, %cst_42 [1, 2] : vector<1x1x256xf32> to vector<1xf32>
      %69 = vector.shape_cast %68 : vector<1xf32> to vector<1x1x1xf32>
      %70 = vector.extract %69[0, 0, 0] : f32 from vector<1x1x1xf32>
      %cst_43 = arith.constant 2.000000e+00 : f32
      %71 = arith.mulf %cst_43, %70 : f32
      %c0_44 = arith.constant 0 : index
      %c0_45 = arith.constant 0 : index
      %72 = vector.load %arg11[%c0_44, %c0_45] : memref<1x1xf32, #tpu.memory_space<vmem>>, vector<1x1xf32>
      %73 = vector.broadcast %71 : f32 to vector<1x1xf32>
      %74 = arith.subf %73, %72 : vector<1x1xf32>
      %75 = vector.broadcast %65 : f32 to vector<1x1xf32>
      %76 = arith.subf %74, %75 : vector<1x1xf32>
      %cst_46 = arith.constant 0.000000e+00 : f32
      %77 = vector.broadcast %cst_46 : f32 to vector<1x1xf32>
      %78 = arith.subf %77, %76 : vector<1x1xf32>
      %cst_47 = arith.constant 0.001953125 : f32
      %79 = vector.broadcast %cst_47 : f32 to vector<1x1xf32>
      %80 = arith.mulf %78, %79 : vector<1x1xf32>
      %c0_48 = arith.constant 0 : index
      %c0_49 = arith.constant 0 : index
      %81 = vector.load %arg4[%c0_48, %c0_49] : memref<1x1xf32, #tpu.memory_space<vmem>>, vector<1x1xf32>
      tpu.vector_store %arg4[%c0_48, %c0_49], %80 {strides = array<i32>} : memref<1x1xf32, #tpu.memory_space<vmem>>, vector<1x1xf32>,
    } else {
    }
    return
  }
  func.func @transform_0(%arg0: i32) -> (i32, i32) {
    %c0_i32 = arith.constant 0 : i32
    %c0_i32_0 = arith.constant 0 : i32
    return %arg0, %c0_i32 : i32, i32
  }
  func.func @transform_2(%arg0: i32) -> (i32, i32) {
    %c0_i32 = arith.constant 0 : i32
    %c0_i32_0 = arith.constant 0 : i32
    return %arg0, %c0_i32 : i32, i32
  }
  func.func @transform_3(%arg0: i32) -> (i32, i32) {
    %c0_i32 = arith.constant 0 : i32
    %c0_i32_0 = arith.constant 0 : i32
    %c0_i32_1 = arith.constant 0 : i32
    return %c0_i32, %c0_i32_0 : i32, i32
  }
}

</mosaic_0001>

<bundles_post_ra>
// kernel: tpu_custom_call.1
= control target key start
LH: loop header
LB: loop body
LE: loop exit
PB: predicated region body
PF: predicated region fallthrough
CT: control target
= control target key end

     0   :  { %8 = vsyncpa [#allocation10], 0  ;;  %s1570_s12 = smov 0   ;;  %s2140_s0 = inlined_call_operand.vmem [shape: f32[256,32], index: 0, kind: input, shape index: {}]   ;;  %s2141_s1 = inlined_call_operand.vmem [shape: f32[256,32], index: 1, kind: input, shape index: {}]   ;;  %s2142_s2 = inlined_call_operand.vmem [shape: f32[256,256], index: 2, kind: input, shape index: {}]   ;;  %s2143_s3 = inlined_call_operand.hbm [shape: f32[1,1], index: 3, kind: output, shape index: {}]  }
   0x1 LB: > { %s1576_s13 = sadd.s32 4294967295, %s1545_s12   ;;  %p1265_p0 = scmp.ge.s32.totalorder %s1545_s12, 1  ;;  %s1545_s12 = sphi %s1570_s12, %s14_s12  }
   0x2   : > { %p122_p1 = scmp.lt.s32.totalorder %s1545_s12, 5 }
   0x4   : > { %p123_p2 = pnand %p1265_p0, %p122_p1 }
   0x5   : > { %s1266_s14 = sshll.u32 (!%p123_p2), %s1576_s13, 3  ;;  %p1271_p4 = scmp.ne.s32.totalorder (!%p123_p2), %s1576_s13, 0 }
   0x6   : > { %126 = sbr.rel (%p123_p2) target bundleno = 1089 (0x441), region = 28  ;;  %p146_p3 = scmp.lt.s32.totalorder (!%p123_p2), %s1266_s14, 31 }
   0xd   : > { %s2147_s14 = smov (!%p146_p3, %s1266_s14), 31  ;;  %162 = sbr.rel (%p1271_p4) target bundleno = 257 (0x101), region = 32 }
   0xe   : > { %s1267_s15 = sshll.u32 %s2147_s14, 3  ;;  %s1297_s16 = sshll.u32 %s2147_s14, 4 }
   0xf   : > { %s1584_s19 = scalar_lea.vmem %s2140_s0, %s1267_s15  ;;  %s1589_s22 = scalar_lea.vmem %s2142_s2, %s1297_s16 }
  0x14   : > { %v1595_v0 = vld [vmem:[%s2141_s1] sm:$0xff]  ;;  %v1600_v1 = vld [vmem:[%s2141_s1 + $0x8] sm:$0xff]  ;;  %v1605_v2 = vld [vmem:[%s2141_s1 + $0x10] sm:$0xff] }
  0x15   : > { %v1610_v3 = vld [vmem:[%s2141_s1 + $0x18] sm:$0xff]  ;;  %v1615_v4 = vld [vmem:[%s2141_s1 + $0x20] sm:$0xff]  ;;  %v1620_v5 = vld [vmem:[%s2141_s1 + $0x28] sm:$0xff] }
  0x16   : > { %v1625_v6 = vld [vmem:[%s2141_s1 + $0x30] sm:$0xff]  ;;  %v1630_v7 = vld [vmem:[%s2141_s1 + $0x38] sm:$0xff]  ;;  %v1635_v8 = vld [vmem:[%s2141_s1 + $0x40] sm:$0xff] }
  0x17   : > { %v1640_v9 = vld [vmem:[%s2141_s1 + $0x48] sm:$0xff]  ;;  %v1645_v10 = vld [vmem:[%s2141_s1 + $0x50] sm:$0xff]  ;;  %v1650_v11 = vld [vmem:[%s2141_s1 + $0x58] sm:$0xff] }
  0x18   : > { %v1655_v12 = vld [vmem:[%s2141_s1 + $0x60] sm:$0xff]  ;;  %v1660_v13 = vld [vmem:[%s2141_s1 + $0x68] sm:$0xff]  ;;  %v1665_v14 = vld [vmem:[%s2141_s1 + $0x70] sm:$0xff] }
  0x19   : > { %v1670_v15 = vld [vmem:[%s2141_s1 + $0x78] sm:$0xff]  ;;  %v1675_v16 = vld [vmem:[%s2141_s1 + $0x80] sm:$0xff]  ;;  %v1680_v17 = vld [vmem:[%s2141_s1 + $0x88] sm:$0xff] }
  0x1a   : > { %v1685_v18 = vld [vmem:[%s2141_s1 + $0x90] sm:$0xff]  ;;  %v1690_v19 = vld [vmem:[%s2141_s1 + $0x98] sm:$0xff]  ;;  %v1695_v20 = vld [vmem:[%s2141_s1 + $0xa0] sm:$0xff] }
  0x1b   : > { %v1700_v21 = vld [vmem:[%s2141_s1 + $0xa8] sm:$0xff]  ;;  %v1705_v22 = vld [vmem:[%s2141_s1 + $0xb0] sm:$0xff]  ;;  %v1710_v23 = vld [vmem:[%s2141_s1 + $0xb8] sm:$0xff] }
  0x1c   : > { %v1715_v24 = vld [vmem:[%s2141_s1 + $0xc0] sm:$0xff]  ;;  %v1720_v25 = vld [vmem:[%s2141_s1 + $0xc8] sm:$0xff]  ;;  %v1725_v26 = vld [vmem:[%s2141_s1 + $0xd0] sm:$0xff] }
  0x1d   : > { %v1730_v27 = vld [vmem:[%s2141_s1 + $0xd8] sm:$0xff]  ;;  %v1735_v28 = vld [vmem:[%s2141_s1 + $0xe0] sm:$0xff]  ;;  %v1740_v29 = vld [vmem:[%s2141_s1 + $0xe8] sm:$0xff] }
  0x1e   : > { %v1745_v30 = vld [vmem:[%s2141_s1 + $0xf0] sm:$0xff]  ;;  %v1750_v31 = vld [vmem:[%s2141_s1 + $0xf8] sm:$0xff] }
  0x1f   : > { %266 = vsyncadd [#allocation11], 4096 }
  0x20   : > { %1537 = dma.done.wait [#allocation11], 4096 }
  0x21   : > { %1538 = vsyncadd [#allocation11], 4294963200  ;;  %v304_v32 = vmul.f32 %v1605_v2, %v1605_v2  ;;  %vm334_vm0 = vcmask 261120   ;;  %v302_v33 = vmul.f32 %v1595_v0, %v1595_v0  ;;  %v305_v34 = vmul.f32 %v1610_v3, %v1610_v3 }
  0x22   : > { %v303_v35 = vmul.f32 %v1600_v1, %v1600_v1  ;;  %v307_v40 = vmul.f32 %v1620_v5, %v1620_v5  ;;  %v306_v41 = vmul.f32 %v1615_v4, %v1615_v4  ;;  %v309_v44 = vmul.f32 %v1630_v7, %v1630_v7 }
  0x23   : > { %v341_v36 = vsel %vm334_vm0, %v304_v32, 0.0  ;;  %v335_v37 = vsel %vm334_vm0, %v302_v33, 0.0  ;;  %v344_v38 = vsel %vm334_vm0, %v305_v34, 0.0  ;;  %v308_v45 = vmul.f32 %v1625_v6, %v1625_v6 }
  0x24   : > { %342 = vadd.xlane.f32.xlu1 %v341_v36  ;;  %336 = vadd.xlane.f32.xlu0 %v335_v37  ;;  %v338_v39 = vsel %vm334_vm0, %v303_v35, 0.0  ;;  %v350_v42 = vsel %vm334_vm0, %v307_v40, 0.0  ;;  %v347_v43 = vsel %vm334_vm0, %v306_v41, 0.0  ;;  %v356_v46 = vsel %vm334_vm0, %v309_v44, 0.0 }
  0x25   : > { %v353_v47 = vsel %vm334_vm0, %v308_v45, 0.0  ;;  %v311_v48 = vmul.f32 %v1640_v9, %v1640_v9  ;;  %v310_v49 = vmul.f32 %v1635_v8, %v1635_v8  ;;  %v313_v52 = vmul.f32 %v1650_v11, %v1650_v11 }
  0x26   : > { %v312_v53 = vmul.f32 %v1645_v10, %v1645_v10  ;;  %v315_v56 = vmul.f32 %v1660_v13, %v1660_v13  ;;  %v314_v57 = vmul.f32 %v1655_v12, %v1655_v12  ;;  %v317_v60 = vmul.f32 %v1670_v15, %v1670_v15 }
  0x27   : > { %v362_v50 = vsel %vm334_vm0, %v311_v48, 0.0  ;;  %v359_v51 = vsel %vm334_vm0, %v310_v49, 0.0  ;;  %v368_v54 = vsel %vm334_vm0, %v313_v52, 0.0  ;;  %v316_v61 = vmul.f32 %v1665_v14, %v1665_v14 }
  0x28   : > { %345 = vadd.xlane.f32.xlu1 %v344_v38  ;;  %339 = vadd.xlane.f32.xlu0 %v338_v39  ;;  %v365_v55 = vsel %vm334_vm0, %v312_v53, 0.0  ;;  %v374_v58 = vsel %vm334_vm0, %v315_v56, 0.0  ;;  %v371_v59 = vsel %vm334_vm0, %v314_v57, 0.0  ;;  %v380_v62 = vsel %vm334_vm0, %v317_v60, 0.0 }
  0x29   : > { %v377_v63 = vsel %vm334_vm0, %v316_v61, 0.0  ;;  %v319_v32 = vmul.f32 %v1680_v17, %v1680_v17  ;;  %v318_v33 = vmul.f32 %v1675_v16, %v1675_v16  ;;  %v321_v36 = vmul.f32 %v1690_v19, %v1690_v19 }
  0x2a   : > { %v320_v37 = vmul.f32 %v1685_v18, %v1685_v18  ;;  %v323_v40 = vmul.f32 %v1700_v21, %v1700_v21  ;;  %v322_v41 = vmul.f32 %v1695_v20, %v1695_v20  ;;  %v325_v44 = vmul.f32 %v1710_v23, %v1710_v23 }
  0x2b   : > { %v386_v34 = vsel %vm334_vm0, %v319_v32, 0.0  ;;  %v383_v35 = vsel %vm334_vm0, %v318_v33, 0.0  ;;  %v392_v38 = vsel %vm334_vm0, %v321_v36, 0.0  ;;  %v324_v45 = vmul.f32 %v1705_v22, %v1705_v22 }
  0x2c   : > { %351 = vadd.xlane.f32.xlu1 %v350_v42  ;;  %348 = vadd.xlane.f32.xlu0 %v347_v43  ;;  %v389_v39 = vsel %vm334_vm0, %v320_v37, 0.0  ;;  %v398_v42 = vsel %vm334_vm0, %v323_v40, 0.0  ;;  %v395_v43 = vsel %vm334_vm0, %v322_v41, 0.0  ;;  %v327_v48 = vmul.f32 %v1720_v25, %v1720_v25 }
  0x2d   : > { %v326_v49 = vmul.f32 %v1715_v24, %v1715_v24  ;;  %v329_v52 = vmul.f32 %v1730_v27, %v1730_v27  ;;  %v328_v53 = vmul.f32 %v1725_v26, %v1725_v26  ;;  %v331_v56 = vmul.f32 %v1740_v29, %v1740_v29 }
  0x2e   : > { %v330_v57 = vmul.f32 %v1735_v28, %v1735_v28  ;;  %v333_v60 = vmul.f32 %v1750_v31, %v1750_v31  ;;  %v332_v61 = vmul.f32 %v1745_v30, %v1745_v30  ;;  %v559_v32 = vlaneseq }
  0x2f   : > { %vm566_vm2 = vcmask 0   ;;  %v1547_v33 = vmov 0.0  }
  0x30   : > { %357 = vadd.xlane.f32.xlu1 %v356_v46  ;;  %354 = vadd.xlane.f32.xlu0 %v353_v47  ;;  %v404_v46 = vsel %vm334_vm0, %v325_v44, 0.0  ;;  %v401_v47 = vsel %vm334_vm0, %v324_v45, 0.0  ;;  %vm561_vm1 = vcmp.lt.s32.totalorder %v559_v32, 256  ;;  %567 = vst.msk [vmem:[#allocation8] sm:$0x1] %vm566_vm2, %v1547_v33 }
  0x31   : > { %563 = vst.msk [vmem:[#allocation5] sm:$0x3] %vm561_vm1, %v1547_v33  ;;  %564 = vst.msk [vmem:[#allocation6] sm:$0x3] %vm561_vm1, %v1547_v33 }
  0x32   : > { %565 = vst.msk [vmem:[#allocation7] sm:$0x3] %vm561_vm1, %v1547_v33 }
  0x34   : > { %363 = vadd.xlane.f32.xlu1 %v362_v50  ;;  %360 = vadd.xlane.f32.xlu0 %v359_v51  ;;  %v410_v50 = vsel %vm334_vm0, %v327_v48, 0.0  ;;  %v407_v51 = vsel %vm334_vm0, %v326_v49, 0.0 }
  0x38   : > { %369 = vadd.xlane.f32.xlu1 %v368_v54  ;;  %366 = vadd.xlane.f32.xlu0 %v365_v55  ;;  %v416_v54 = vsel %vm334_vm0, %v329_v52, 0.0  ;;  %v413_v55 = vsel %vm334_vm0, %v328_v53, 0.0 }
  0x3c   : > { %375 = vadd.xlane.f32.xlu1 %v374_v58  ;;  %372 = vadd.xlane.f32.xlu0 %v371_v59  ;;  %v422_v58 = vsel %vm334_vm0, %v331_v56, 0.0  ;;  %v419_v59 = vsel %vm334_vm0, %v330_v57, 0.0 }
  0x40   : > { %381 = vadd.xlane.f32.xlu1 %v380_v62  ;;  %378 = vadd.xlane.f32.xlu0 %v377_v63  ;;  %v428_v62 = vsel %vm334_vm0, %v333_v60, 0.0  ;;  %v425_v63 = vsel %vm334_vm0, %v332_v61, 0.0 }
  0x44   : > { %387 = vadd.xlane.f32.xlu1 %v386_v34  ;;  %384 = vadd.xlane.f32.xlu0 %v383_v35 }
  0x48   : > { %393 = vadd.xlane.f32.xlu1 %v392_v38  ;;  %390 = vadd.xlane.f32.xlu0 %v389_v39 }
  0x4c   : > { %399 = vadd.xlane.f32.xlu1 %v398_v42  ;;  %396 = vadd.xlane.f32.xlu0 %v395_v43 }
  0x50   : > { %405 = vadd.xlane.f32.xlu1 %v404_v46  ;;  %402 = vadd.xlane.f32.xlu0 %v401_v47 }
  0x54   : > { %411 = vadd.xlane.f32.xlu1 %v410_v50  ;;  %408 = vadd.xlane.f32.xlu0 %v407_v51 }
  0x58   : > { %417 = vadd.xlane.f32.xlu1 %v416_v54  ;;  %414 = vadd.xlane.f32.xlu0 %v413_v55 }
  0x5c   : > { %423 = vadd.xlane.f32.xlu1 %v422_v58  ;;  %420 = vadd.xlane.f32.xlu0 %v419_v59 }
  0x60   : > { %429 = vadd.xlane.f32.xlu1 %v428_v62  ;;  %426 = vadd.xlane.f32.xlu0 %v425_v63 }
  0xb1   : > { %v343_v34 = vpop.xlane.xlu1 %342  ;;  %v337_v35 = vpop.xlane.xlu0 %336 }
  0xb2   : > { %v433_v36 = vmax.f32 %v343_v34, 1e-24  ;;  %v431_v37 = vmax.f32 %v337_v35, 1e-24 }
  0xb4   : > { %1377 = vrsqrt.f32 %v433_v36 }
  0xb5   : > { %v346_v38 = vpop.xlane.xlu1 %345  ;;  %v340_v39 = vpop.xlane.xlu0 %339  ;;  %1379 = vrsqrt.f32 %v431_v37 }
  0xb6   : > { %v434_v40 = vmax.f32 %v346_v38, 1e-24  ;;  %v432_v41 = vmax.f32 %v340_v39, 1e-24 }
  0xb8   : > { %1381 = vrsqrt.f32 %v434_v40 }
  0xb9   : > { %1383 = vrsqrt.f32 %v432_v41  ;;  %v352_v42 = vpop.xlane.xlu1 %351  ;;  %v349_v43 = vpop.xlane.xlu0 %348 }
  0xba   : > { %v436_v44 = vmax.f32 %v352_v42, 1e-24  ;;  %v435_v45 = vmax.f32 %v349_v43, 1e-24 }
  0xbc   : > { %1385 = vrsqrt.f32 %v436_v44 }
  0xbd   : > { %1387 = vrsqrt.f32 %v435_v45  ;;  %v358_v46 = vpop.xlane.xlu1 %357  ;;  %v355_v47 = vpop.xlane.xlu0 %354 }
  0xbe   : > { %v438_v48 = vmax.f32 %v358_v46, 1e-24  ;;  %v437_v49 = vmax.f32 %v355_v47, 1e-24  ;;  %v1378_v50 = vpop.eup %1377 }
  0xbf   : > { %v1380_v51 = vpop.eup %1379  ;;  %v497_v58 = vmul.f32 %v1378_v50, %v1605_v2 }
  0xc0   : > { %1389 = vrsqrt.f32 %v438_v48  ;;  %v495_v60 = vmul.f32 %v1380_v51, %v1595_v0 }
  0xc1   : > { %1391 = vrsqrt.f32 %v437_v49  ;;  %v364_v52 = vpop.xlane.xlu1 %363  ;;  %v361_v53 = vpop.xlane.xlu0 %360 }
  0xc2   : > { %v1382_v54 = vpop.eup %1381  ;;  %v440_v55 = vmax.f32 %v364_v52, 1e-24  ;;  %v439_v56 = vmax.f32 %v361_v53, 1e-24 }
  0xc3   : > { %v1384_v57 = vpop.eup %1383  ;;  %v498_v59 = vmul.f32 %v1382_v54, %v1610_v3 }
  0xc4   : > { %v496_v61 = vmul.f32 %v1384_v57, %v1600_v1  ;;  %1393 = vrsqrt.f32 %v440_v55 }
  0xc5   : > { %v528_v62 = vpack.c.bf16 %v498_v59, %v497_v58  ;;  %1395 = vrsqrt.f32 %v439_v56  ;;  %v370_v63 = vpop.xlane.xlu1 %369  ;;  %v367_v32 = vpop.xlane.xlu0 %366 }
  0xc6   : > { %v1386_v33 = vpop.eup %1385  ;;  %v527_v34 = vpack.c.bf16 %v496_v61, %v495_v60  ;;  %v442_v35 = vmax.f32 %v370_v63, 1e-24  ;;  %v441_v36 = vmax.f32 %v367_v32, 1e-24 }
  0xc7   : > { %v1388_v37 = vpop.eup %1387  ;;  %544 = vst.msk [vmem:[#allocation3 + $0x8] sm:$0xff] %vm334_vm0, %v528_v62  ;;  %v500_v2 = vmul.f32 %v1386_v33, %v1620_v5 }
  0xc8   : > { %543 = vst.msk [vmem:[#allocation3] sm:$0xff] %vm334_vm0, %v527_v34  ;;  %v499_v0 = vmul.f32 %v1388_v37, %v1615_v4  ;;  %1397 = vrsqrt.f32 %v442_v35 }
  0xc9   : > { %1399 = vrsqrt.f32 %v441_v36  ;;  %v376_v1 = vpop.xlane.xlu1 %375  ;;  %v373_v3 = vpop.xlane.xlu0 %372 }
  0xca   : > { %v1390_v38 = vpop.eup %1389  ;;  %v529_v39 = vpack.c.bf16 %v500_v2, %v499_v0  ;;  %v444_v40 = vmax.f32 %v376_v1, 1e-24  ;;  %v443_v41 = vmax.f32 %v373_v3, 1e-24 }
  0xcb   : > { %v1392_v42 = vpop.eup %1391  ;;  %v502_v43 = vmul.f32 %v1390_v38, %v1630_v7 }
  0xcc   : > { %545 = vst.msk [vmem:[#allocation3 + $0x10] sm:$0xff] %vm334_vm0, %v529_v39  ;;  %v501_v44 = vmul.f32 %v1392_v42, %v1625_v6  ;;  %1401 = vrsqrt.f32 %v444_v40 }
  0xcd   : > { %1403 = vrsqrt.f32 %v443_v41  ;;  %v382_v5 = vpop.xlane.xlu1 %381  ;;  %v379_v45 = vpop.xlane.xlu0 %378 }
  0xce   : > { %v1394_v4 = vpop.eup %1393  ;;  %v530_v46 = vpack.c.bf16 %v502_v43, %v501_v44  ;;  %v446_v47 = vmax.f32 %v382_v5, 1e-24  ;;  %v445_v48 = vmax.f32 %v379_v45, 1e-24 }
  0xcf   : > { %v1396_v49 = vpop.eup %1395  ;;  %v504_v50 = vmul.f32 %v1394_v4, %v1640_v9 }
  0xd0   : > { %546 = vst.msk [vmem:[#allocation3 + $0x18] sm:$0xff] %vm334_vm0, %v530_v46  ;;  %v503_v51 = vmul.f32 %v1396_v49, %v1635_v8  ;;  %1405 = vrsqrt.f32 %v446_v47 }
  0xd1   : > { %1407 = vrsqrt.f32 %v445_v48  ;;  %v388_v7 = vpop.xlane.xlu1 %387  ;;  %v385_v52 = vpop.xlane.xlu0 %384 }
  0xd2   : > { %v1398_v6 = vpop.eup %1397  ;;  %v531_v53 = vpack.c.bf16 %v504_v50, %v503_v51  ;;  %v448_v54 = vmax.f32 %v388_v7, 1e-24  ;;  %v447_v55 = vmax.f32 %v385_v52, 1e-24 }
  0xd3   : > { %v1400_v56 = vpop.eup %1399  ;;  %v506_v57 = vmul.f32 %v1398_v6, %v1650_v11 }
  0xd4   : > { %547 = vst.msk [vmem:[#allocation3 + $0x20] sm:$0xff] %vm334_vm0, %v531_v53  ;;  %v505_v58 = vmul.f32 %v1400_v56, %v1645_v10  ;;  %1409 = vrsqrt.f32 %v448_v54 }
  0xd5   : > { %1411 = vrsqrt.f32 %v447_v55  ;;  %v394_v9 = vpop.xlane.xlu1 %393  ;;  %v391_v59 = vpop.xlane.xlu0 %390 }
  0xd6   : > { %v1402_v8 = vpop.eup %1401  ;;  %v532_v60 = vpack.c.bf16 %v506_v57, %v505_v58  ;;  %v450_v61 = vmax.f32 %v394_v9, 1e-24  ;;  %v449_v62 = vmax.f32 %v391_v59, 1e-24 }
  0xd7   : > { %v1404_v63 = vpop.eup %1403  ;;  %v508_v32 = vmul.f32 %v1402_v8, %v1660_v13 }
  0xd8   : > { %548 = vst.msk [vmem:[#allocation3 + $0x28] sm:$0xff] %vm334_vm0, %v532_v60  ;;  %v507_v33 = vmul.f32 %v1404_v63, %v1655_v12  ;;  %1413 = vrsqrt.f32 %v450_v61 }
  0xd9   : > { %1415 = vrsqrt.f32 %v449_v62  ;;  %v400_v11 = vpop.xlane.xlu1 %399  ;;  %v397_v34 = vpop.xlane.xlu0 %396 }
  0xda   : > { %v1406_v10 = vpop.eup %1405  ;;  %v533_v35 = vpack.c.bf16 %v508_v32, %v507_v33  ;;  %v452_v36 = vmax.f32 %v400_v11, 1e-24  ;;  %v451_v37 = vmax.f32 %v397_v34, 1e-24 }
  0xdb   : > { %v1408_v2 = vpop.eup %1407  ;;  %v510_v0 = vmul.f32 %v1406_v10, %v1670_v15 }
  0xdc   : > { %549 = vst.msk [vmem:[#allocation3 + $0x30] sm:$0xff] %vm334_vm0, %v533_v35  ;;  %v509_v1 = vmul.f32 %v1408_v2, %v1665_v14  ;;  %1417 = vrsqrt.f32 %v452_v36 }
  0xdd   : > { %1419 = vrsqrt.f32 %v451_v37  ;;  %v406_v13 = vpop.xlane.xlu1 %405  ;;  %v403_v3 = vpop.xlane.xlu0 %402 }
  0xde   : > { %v1410_v12 = vpop.eup %1409  ;;  %v534_v38 = vpack.c.bf16 %v510_v0, %v509_v1  ;;  %v454_v39 = vmax.f32 %v406_v13, 1e-24  ;;  %v453_v40 = vmax.f32 %v403_v3, 1e-24 }
  0xdf   : > { %v1412_v41 = vpop.eup %1411  ;;  %v512_v42 = vmul.f32 %v1410_v12, %v1680_v17 }
  0xe0   : > { %550 = vst.msk [vmem:[#allocation3 + $0x38] sm:$0xff] %vm334_vm0, %v534_v38  ;;  %v511_v43 = vmul.f32 %v1412_v41, %v1675_v16  ;;  %1421 = vrsqrt.f32 %v454_v39 }
  0xe1   : > { %1423 = vrsqrt.f32 %v453_v40  ;;  %v412_v15 = vpop.xlane.xlu1 %411  ;;  %v409_v44 = vpop.xlane.xlu0 %408 }
  0xe2   : > { %v1414_v14 = vpop.eup %1413  ;;  %v535_v5 = vpack.c.bf16 %v512_v42, %v511_v43  ;;  %v456_v45 = vmax.f32 %v412_v15, 1e-24  ;;  %v455_v4 = vmax.f32 %v409_v44, 1e-24 }
  0xe3   : > { %v1416_v46 = vpop.eup %1415  ;;  %v514_v47 = vmul.f32 %v1414_v14, %v1690_v19 }
  0xe4   : > { %551 = vst.msk [vmem:[#allocation3 + $0x40] sm:$0xff] %vm334_vm0, %v535_v5  ;;  %v513_v48 = vmul.f32 %v1416_v46, %v1685_v18  ;;  %1425 = vrsqrt.f32 %v456_v45 }
  0xe5   : > { %1427 = vrsqrt.f32 %v455_v4  ;;  %v418_v17 = vpop.xlane.xlu1 %417  ;;  %v415_v49 = vpop.xlane.xlu0 %414 }
  0xe6   : > { %v1418_v16 = vpop.eup %1417  ;;  %v536_v50 = vpack.c.bf16 %v514_v47, %v513_v48  ;;  %v458_v51 = vmax.f32 %v418_v17, 1e-24  ;;  %v457_v7 = vmax.f32 %v415_v49, 1e-24 }
  0xe7   : > { %v1420_v52 = vpop.eup %1419  ;;  %v516_v6 = vmul.f32 %v1418_v16, %v1700_v21 }
  0xe8   : > { %552 = vst.msk [vmem:[#allocation3 + $0x48] sm:$0xff] %vm334_vm0, %v536_v50  ;;  %v515_v53 = vmul.f32 %v1420_v52, %v1695_v20  ;;  %1429 = vrsqrt.f32 %v458_v51 }
  0xe9   : > { %1431 = vrsqrt.f32 %v457_v7  ;;  %v424_v19 = vpop.xlane.xlu1 %423  ;;  %v421_v54 = vpop.xlane.xlu0 %420 }
  0xea   : > { %v1422_v18 = vpop.eup %1421  ;;  %v537_v55 = vpack.c.bf16 %v516_v6, %v515_v53  ;;  %v460_v56 = vmax.f32 %v424_v19, 1e-24  ;;  %v459_v57 = vmax.f32 %v421_v54, 1e-24 }
  0xeb   : > { %v1424_v58 = vpop.eup %1423  ;;  %v518_v9 = vmul.f32 %v1422_v18, %v1710_v23 }
  0xec   : > { %553 = vst.msk [vmem:[#allocation3 + $0x50] sm:$0xff] %vm334_vm0, %v537_v55  ;;  %v517_v59 = vmul.f32 %v1424_v58, %v1705_v22  ;;  %1433 = vrsqrt.f32 %v460_v56 }
  0xed   : > { %1435 = vrsqrt.f32 %v459_v57  ;;  %v430_v21 = vpop.xlane.xlu1 %429  ;;  %v427_v8 = vpop.xlane.xlu0 %426 }
  0xee   : > { %v1426_v20 = vpop.eup %1425  ;;  %v538_v60 = vpack.c.bf16 %v518_v9, %v517_v59  ;;  %v462_v61 = vmax.f32 %v430_v21, 1e-24  ;;  %v461_v62 = vmax.f32 %v427_v8, 1e-24 }
  0xef   : > { %v1428_v63 = vpop.eup %1427  ;;  %v520_v32 = vmul.f32 %v1426_v20, %v1720_v25 }
  0xf0   : > { %554 = vst.msk [vmem:[#allocation3 + $0x58] sm:$0xff] %vm334_vm0, %v538_v60  ;;  %v519_v33 = vmul.f32 %v1428_v63, %v1715_v24  ;;  %1437 = vrsqrt.f32 %v462_v61 }
  0xf1   : > { %1439 = vrsqrt.f32 %v461_v62 }
  0xf2   : > { %v1430_v23 = vpop.eup %1429  ;;  %v539_v11 = vpack.c.bf16 %v520_v32, %v519_v33 }
  0xf3   : > { %v1432_v22 = vpop.eup %1431  ;;  %v522_v34 = vmul.f32 %v1430_v23, %v1730_v27 }
  0xf4   : > { %555 = vst.msk [vmem:[#allocation3 + $0x60] sm:$0xff] %vm334_vm0, %v539_v11  ;;  %v521_v10 = vmul.f32 %v1432_v22, %v1725_v26 }
  0xf6   : > { %v1434_v35 = vpop.eup %1433  ;;  %v540_v36 = vpack.c.bf16 %v522_v34, %v521_v10 }
  0xf7   : > { %v1436_v37 = vpop.eup %1435  ;;  %v524_v25 = vmul.f32 %v1434_v35, %v1740_v29 }
  0xf8   : > { %556 = vst.msk [vmem:[#allocation3 + $0x68] sm:$0xff] %vm334_vm0, %v540_v36  ;;  %v523_v24 = vmul.f32 %v1436_v37, %v1735_v28 }
  0xfa   : > { %v1438_v2 = vpop.eup %1437  ;;  %v541_v0 = vpack.c.bf16 %v524_v25, %v523_v24 }
  0xfb   : > { %v1440_v1 = vpop.eup %1439  ;;  %v526_v13 = vmul.f32 %v1438_v2, %v1750_v31 }
  0xfc   : > { %557 = vst.msk [vmem:[#allocation3 + $0x70] sm:$0xff] %vm334_vm0, %v541_v0  ;;  %v525_v27 = vmul.f32 %v1440_v1, %v1745_v30 }
  0xfe   : > { %v542_v3 = vpack.c.bf16 %v526_v13, %v525_v27 }
 0x100   : > { %558 = vst.msk [vmem:[#allocation3 + $0x78] sm:$0xff] %vm334_vm0, %v542_v3 }
 0x101 PF: > { %v1897_v26 = vld [vmem:[%s1584_s19 + $0x10] sm:$0xff]  ;;  %vm600_vm3 = vcmask 261120   ;;  %v1900_v28 = vld [vmem:[%s1584_s19] sm:$0xff]  ;;  %v1903_v29 = vld [vmem:[%s1584_s19 + $0x18] sm:$0xff]  ;;  %vm1100_vm5 = vcmask 7168   ;;  %vm1127_vm6 = vcmask 0  }
 0x102   : > { %v594_v30 = vmul.f32 %v1897_v26, %v1897_v26  ;;  %v592_v31 = vmul.f32 %v1900_v28, %v1900_v28  ;;  %v595_v12 = vmul.f32 %v1903_v29, %v1903_v29  ;;  %v1912_v38 = vld [vmem:[%s1584_s19 + $0x8] sm:$0xff]  ;;  %v1920_v41 = vld [vmem:[%s1584_s19 + $0x20] sm:$0xff]  ;;  %v1934_v48 = vld [vmem:[%s1584_s19 + $0x38] sm:$0xff]  ;;  %p1292_p5 = scmp.ne.s32.totalorder %s1576_s13, 3 }
 0x103   : > { %v1915_v39 = vld [vmem:[%s1584_s19 + $0x28] sm:$0xff]  ;;  %v593_v40 = vmul.f32 %v1912_v38, %v1912_v38  ;;  %v669_v42 = vld [vmem:[#allocation3 + $0x40] sm:$0xff]  ;;  %v596_v46 = vmul.f32 %v1920_v41, %v1920_v41  ;;  %v1937_v17 = vld [vmem:[%s1584_s19 + $0x30] sm:$0xff]  ;;  %v599_v51 = vmul.f32 %v1934_v48, %v1934_v48  ;;  %vm1150_vm7 = vcmask (!%p1292_p5), 1040384  }
 0x104   : > { %v607_v43 = vsel %vm600_vm3, %v594_v30, 0.0  ;;  %v601_v15 = vsel %vm600_vm3, %v592_v31, 0.0  ;;  %1338 = vmatprep.subr.msk.bf16.mxu0 %vm600_vm3, %v669_v42  ;;  %v661_v44 = vld [vmem:[#allocation3] sm:$0xff]  ;;  %1339 = vmatprep.subr.msk.bf16.mxu1 %vm600_vm3, %v669_v42  ;;  %v597_v14 = vmul.f32 %v1915_v39, %v1915_v39  ;;  %v670_v5 = vld [vmem:[#allocation3 + $0x48] sm:$0xff]  ;;  %v610_v45 = vsel %vm600_vm3, %v595_v12, 0.0  ;;  %v671_v6 = vld [vmem:[#allocation3 + $0x50] sm:$0xff] }
 0x105   : > { %608 = vadd.xlane.f32.xlu1 %v607_v43  ;;  %602 = vadd.xlane.f32.xlu0 %v601_v15  ;;  %v604_v4 = vsel %vm600_vm3, %v593_v40, 0.0  ;;  %v690_v47 = vsel %vm600_vm3, %v661_v44, 0  ;;  %v662_v49 = vld [vmem:[#allocation3 + $0x8] sm:$0xff]  ;;  %v613_v50 = vsel %vm600_vm3, %v596_v46, 0.0  ;;  %v598_v7 = vmul.f32 %v1937_v17, %v1937_v17  ;;  %v663_v54 = vld [vmem:[#allocation3 + $0x10] sm:$0xff]  ;;  %v672_v55 = vld [vmem:[#allocation3 + $0x58] sm:$0xff] }
 0x106   : > { %1299 = vmatpush3.bf16.xpose.msra.mxu0 %v690_v47  ;;  %1330 = vmatpush3.bf16.xpose.msra.mxu1 %v690_v47  ;;  %v616_v16 = vsel %vm600_vm3, %v597_v14, 0.0  ;;  %v693_v52 = vsel %vm600_vm3, %v662_v49, 0  ;;  %v622_v53 = vsel %vm600_vm3, %v599_v51, 0.0  ;;  %v696_v18 = vsel %vm600_vm3, %v663_v54, 0  ;;  %v664_v56 = vld [vmem:[#allocation3 + $0x18] sm:$0xff]  ;;  %v673_v58 = vld [vmem:[#allocation3 + $0x60] sm:$0xff] }
 0x107   : > { %1340 = vmatprep.subr.msk.bf16.mxu0 %vm600_vm3, %v670_v5  ;;  %1341 = vmatprep.subr.msk.bf16.mxu1 %vm600_vm3, %v670_v5  ;;  %v619_v19 = vsel %vm600_vm3, %v598_v7, 0.0  ;;  %v699_v57 = vsel %vm600_vm3, %v664_v56, 0  ;;  %v665_v9 = vld [vmem:[#allocation3 + $0x20] sm:$0xff]  ;;  %v674_v21 = vld [vmem:[#allocation3 + $0x68] sm:$0xff]  ;;  %v675_v60 = vld [vmem:[#allocation3 + $0x70] sm:$0xff] }
 0x108   : > { %v702_v59 = vsel %vm600_vm3, %v665_v9, 0  ;;  %v666_v8 = vld [vmem:[#allocation3 + $0x28] sm:$0xff]  ;;  %v667_v61 = vld [vmem:[#allocation3 + $0x30] sm:$0xff]  ;;  %v676_v63 = vld [vmem:[#allocation3 + $0x78] sm:$0xff] }
 0x109   : > { %611 = vadd.xlane.f32.xlu1 %v610_v45  ;;  %605 = vadd.xlane.f32.xlu0 %v604_v4  ;;  %v705_v20 = vsel %vm600_vm3, %v666_v8, 0  ;;  %v708_v62 = vsel %vm600_vm3, %v667_v61, 0  ;;  %v668_v32 = vld [vmem:[#allocation3 + $0x38] sm:$0xff]  ;;  %v1993_v54 = vld [vmem:[%s1589_s22 + $0x20] sm:$0xff]  ;;  %v2008_v9 = vld [vmem:[%s1589_s22 + $0x28] sm:$0xff] }
 0x10a   : > { %v711_v33 = vsel %vm600_vm3, %v668_v32, 0  ;;  %v2020_v61 = vld [vmem:[%s1589_s22 + $0x38] sm:$0xff]  ;;  %v2025_v32 = vld [vmem:[%s1589_s22 + $0x60] sm:$0xff] }
 0x10d   : > { %617 = vadd.xlane.f32.xlu1 %v616_v16  ;;  %614 = vadd.xlane.f32.xlu0 %v613_v50 }
 0x10e   : > { %1301 = vmatpush3.bf16.xpose.msra.mxu0 %v693_v52  ;;  %1331 = vmatpush3.bf16.xpose.msra.mxu1 %v693_v52 }
 0x10f   : > { %1342 = vmatprep.subr.msk.bf16.mxu0 %vm600_vm3, %v671_v6  ;;  %1343 = vmatprep.subr.msk.bf16.mxu1 %vm600_vm3, %v671_v6 }
 0x111   : > { %623 = vadd.xlane.f32.xlu1 %v622_v53  ;;  %620 = vadd.xlane.f32.xlu0 %v619_v19  ;;  %v1985_v19 = vld [vmem:[%s1589_s22] sm:$0xff] }
 0x116   : > { %1303 = vmatpush3.bf16.xpose.msra.mxu0 %v696_v18  ;;  %1332 = vmatpush3.bf16.xpose.msra.mxu1 %v696_v18  ;;  %v1996_v18 = vld [vmem:[%s1589_s22 + $0x8] sm:$0xff] }
 0x117   : > { %1344 = vmatprep.subr.msk.bf16.mxu0 %vm600_vm3, %v672_v55  ;;  %1345 = vmatprep.subr.msk.bf16.mxu1 %vm600_vm3, %v672_v55  ;;  %v1999_v55 = vld [vmem:[%s1589_s22 + $0x18] sm:$0xff] }
 0x11e   : > { %1305 = vmatpush3.bf16.xpose.msra.mxu0 %v699_v57  ;;  %1333 = vmatpush3.bf16.xpose.msra.mxu1 %v699_v57  ;;  %v915_v57 = vadd.f32 %v1999_v55, %v1996_v18 }
 0x11f   : > { %1346 = vmatprep.subr.msk.bf16.mxu0 %vm600_vm3, %v673_v58  ;;  %1347 = vmatprep.subr.msk.bf16.mxu1 %vm600_vm3, %v673_v58  ;;  %v2005_v58 = vld [vmem:[%s1589_s22 + $0x30] sm:$0xff] }
 0x120   : > { %v916_v8 = vadd.f32 %v915_v57, %v2008_v9 }
 0x126   : > { %1307 = vmatpush3.bf16.xpose.msra.mxu0 %v702_v59  ;;  %1334 = vmatpush3.bf16.xpose.msra.mxu1 %v702_v59 }
 0x127   : > { %1348 = vmatprep.subr.msk.bf16.mxu0 %vm600_vm3, %v674_v21  ;;  %1349 = vmatprep.subr.msk.bf16.mxu1 %vm600_vm3, %v674_v21  ;;  %v2012_v21 = vld [vmem:[%s1589_s22 + $0x40] sm:$0xff] }
 0x12e   : > { %1309 = vmatpush3.bf16.xpose.msra.mxu0 %v705_v20  ;;  %1335 = vmatpush3.bf16.xpose.msra.mxu1 %v705_v20 }
 0x12f   : > { %1350 = vmatprep.subr.msk.bf16.mxu0 %vm600_vm3, %v675_v60  ;;  %1351 = vmatprep.subr.msk.bf16.mxu1 %vm600_vm3, %v675_v60  ;;  %v2017_v60 = vld [vmem:[%s1589_s22 + $0x50] sm:$0xff] }
 0x136   : > { %1311 = vmatpush3.bf16.xpose.msra.mxu0 %v708_v62  ;;  %1336 = vmatpush3.bf16.xpose.msra.mxu1 %v708_v62 }
 0x137   : > { %1352 = vmatprep.subr.msk.bf16.mxu0 %vm600_vm3, %v676_v63  ;;  %1353 = vmatprep.subr.msk.bf16.mxu1 %vm600_vm3, %v676_v63  ;;  %v917_v63 = vadd.f32 %v916_v8, %v2020_v61 }
 0x13e   : > { %1313 = vmatpush3.bf16.xpose.msra.mxu0 %v711_v33  ;;  %1337 = vmatpush3.bf16.xpose.msra.mxu1 %v711_v33 }
 0x192   : > { %v609_v23 = vpop.xlane.xlu1 %608  ;;  %v603_v11 = vpop.xlane.xlu0 %602 }
 0x193   : > { %v627_v22 = vmax.f32 %v609_v23, 1e-24  ;;  %v625_v34 = vmax.f32 %v603_v11, 1e-24  ;;  %v2029_v23 = vld [vmem:[%s1589_s22 + $0x70] sm:$0xff]  ;;  %v2032_v11 = vld [vmem:[%s1589_s22 + $0x48] sm:$0xff] }
 0x195   : > { %1441 = vrsqrt.f32 %v627_v22 }
 0x196   : > { %1443 = vrsqrt.f32 %v625_v34  ;;  %v612_v10 = vpop.xlane.xlu1 %611  ;;  %v606_v35 = vpop.xlane.xlu0 %605  ;;  %v918_v34 = vadd.f32 %v917_v63, %v2032_v11 }
 0x197   : > { %v628_v36 = vmax.f32 %v612_v10, 1e-24  ;;  %v626_v37 = vmax.f32 %v606_v35, 1e-24  ;;  %v2037_v35 = vld [vmem:[%s1589_s22 + $0x58] sm:$0xff] }
 0x199   : > { %1445 = vrsqrt.f32 %v628_v36  ;;  %v919_v36 = vadd.f32 %v918_v34, %v2037_v35 }
 0x19a   : > { %1447 = vrsqrt.f32 %v626_v37  ;;  %v618_v25 = vpop.xlane.xlu1 %617  ;;  %v615_v24 = vpop.xlane.xlu0 %614 }
 0x19b   : > { %v630_v2 = vmax.f32 %v618_v25, 1e-24  ;;  %v629_v0 = vmax.f32 %v615_v24, 1e-24  ;;  %v2041_v25 = vld [vmem:[%s1589_s22 + $0x68] sm:$0xff] }
 0x19c   : > { %v920_v24 = vadd.f32 %v919_v36, %v2041_v25 }
 0x19d   : > { %1449 = vrsqrt.f32 %v630_v2 }
 0x19e   : > { %1451 = vrsqrt.f32 %v629_v0  ;;  %v624_v1 = vpop.xlane.xlu1 %623  ;;  %v621_v13 = vpop.xlane.xlu0 %620  ;;  %v2045_v0 = vld [vmem:[%s1589_s22 + $0x78] sm:$0xff] }
 0x19f   : > { %v1442_v27 = vpop.eup %1441  ;;  %v632_v3 = vmax.f32 %v624_v1, 1e-24  ;;  %v631_v30 = vmax.f32 %v621_v13, 1e-24  ;;  %v921_v1 = vadd.f32 %v920_v24, %v2045_v0 }
 0x1a0   : > { %v1444_v31 = vpop.eup %1443  ;;  %v643_v40 = vmul.f32 2.7182817, %v1442_v27 }
 0x1a1   : > { %1453 = vrsqrt.f32 %v632_v3  ;;  %v641_v42 = vmul.f32 2.7182817, %v1444_v31  ;;  %v922_v27 = vrot.slane %v921_v1, 4  ;;  %v1548_v31 = vmov 1966171168  }
 0x1a2   : > { %1455 = vrsqrt.f32 %v631_v30  ;;  %v651_v5 = vmul.f32 %v643_v40, %v1897_v26  ;;  %v883_v40 = vlaneseq }
 0x1a3   : > { %v1446_v12 = vpop.eup %1445  ;;  %v649_v4 = vmul.f32 %v641_v42, %v1900_v28  ;;  %v923_v3 = vadd.f32 %v922_v27, %v921_v1 }
 0x1a4   : > { %v1448_v43 = vpop.eup %1447  ;;  %v644_v15 = vmul.f32 2.7182817, %v1446_v12  ;;  %v881_v12 = vunpack.c.l.s4 %v1548_v31  ;;  %vm2055_vm4 = vcmp.lt.s32.totalorder %v883_v40, 256 }
 0x1a5   : > { %v642_v44 = vmul.f32 2.7182817, %v1448_v43  ;;  %v924_v42 = vrot.slane %v923_v3, 2 }
 0x1a6   : > { %v652_v45 = vmul.f32 %v644_v15, %v1903_v29 }
 0x1a7   : > { %v1450_v14 = vpop.eup %1449  ;;  %v650_v46 = vmul.f32 %v642_v44, %v1912_v38  ;;  %v925_v43 = vadd.f32 %v924_v42, %v923_v3  ;;  %v882_v44 = vunpack.c.0.s8 %v881_v12 }
 0x1a8   : > { %v1452_v47 = vpop.eup %1451  ;;  %v646_v49 = vmul.f32 2.7182817, %v1450_v14  ;;  %v658_v52 = vpack.c.bf16 %v652_v45, %v651_v5  ;;  %v2048_v14 = vshrl.u32 %v883_v40, 7 }
 0x1a9   : > { %v645_v16 = vmul.f32 2.7182817, %v1452_v47  ;;  %v657_v50 = vpack.c.bf16 %v650_v46, %v649_v4  ;;  %v926_v5 = vrot.slane %v925_v43, 1 }
 0x1aa   : > { %v654_v51 = vmul.f32 %v646_v49, %v1915_v39  ;;  %v2051_v4 = vsub.s32 %v882_v44, %v2048_v14  ;;  %v901_v49 = vld [vmem:[#allocation6] sm:$0x3] }
 0x1ab   : > { %v1454_v7 = vpop.eup %1453  ;;  %1314 = vmatprep.mubr.msk.bf16.mxu0 %vm600_vm3, %v657_v50  ;;  %v653_v6 = vmul.f32 %v645_v16, %v1920_v41  ;;  %v927_v45 = vadd.f32 %v926_v5, %v925_v43 }
 0x1ac   : > { %v1456_v26 = vpop.eup %1455  ;;  %v648_v29 = vmul.f32 2.7182817, %v1454_v7  ;;  %1315 = vmatmul.mubr.msk.bf16.vlgmr.msra.gmra.mrb[0].mxu0 %vm600_vm3, %v657_v50 }
 0x1ad   : > { %v647_v28 = vmul.f32 2.7182817, %v1456_v26  ;;  %1316 = vmatprep.mubr.msk.bf16.mxu0 %vm600_vm3, %v658_v52  ;;  %v659_v38 = vpack.c.bf16 %v654_v51, %v653_v6 }
 0x1ae   : > { %v656_v39 = vmul.f32 %v648_v29, %v1934_v48  ;;  %v1988_v48 = vld [vmem:[%s1589_s22 + $0x10] sm:$0xff] }
 0x1af   : > { %v655_v53 = vmul.f32 %v647_v28, %v1937_v17  ;;  %1318 = vmatprep.mubr.msk.bf16.mxu1 %vm600_vm3, %v659_v38  ;;  %v902_v17 = vadd.f32 %v1988_v48, %v1985_v19 }
 0x1b0   : > { %1319 = vmatmul.mubr.msk.bf16.vlgmr.msra.gmra.mrb[0].mxu1 %vm600_vm3, %v659_v38 }
 0x1b1   : > { %v660_v41 = vpack.c.bf16 %v656_v39, %v655_v53  ;;  %v903_v56 = vadd.f32 %v902_v17, %v1993_v54 }
 0x1b3   : > { %1320 = vmatprep.mubr.msk.bf16.mxu1 %vm600_vm3, %v660_v41  ;;  %v904_v59 = vadd.f32 %v903_v56, %v2005_v58 }
 0x1b4   : > { %1317 = vmatmul.mubr.msk.bf16.gmra.mrb[4].mxu0 %vm600_vm3, %v658_v52 }
 0x1b5   : > { %v905_v20 = vadd.f32 %v904_v59, %v2012_v21 }
 0x1b7   : > { %v906_v62 = vadd.f32 %v905_v20, %v2017_v60 }
 0x1b8   : > { %1321 = vmatmul.mubr.msk.bf16.gmra.mrb[4].mxu1 %vm600_vm3, %v660_v41 }
 0x1b9   : > { %v907_v33 = vadd.f32 %v906_v62, %v2025_v32 }
 0x1bb   : > { %v908_v22 = vadd.f32 %v907_v33, %v2029_v23 }
 0x1bd   : > { %v909_v10 = vrot.slane %v908_v22, 4 }
 0x1bf   : > { %v910_v37 = vadd.f32 %v909_v10, %v908_v22 }
 0x1c1   : > { %v911_v2 = vrot.slane %v910_v37, 2 }
 0x1c3   : > { %v912_v13 = vadd.f32 %v911_v2, %v910_v37 }
 0x1c5   : > { %v913_v30 = vrot.slane %v912_v13, 1 }
 0x1c7   : > { %v914_v15 = vadd.f32 %v913_v30, %v912_v13 }
 0x1c9   : > { %v930_v46 = vcombine.low %v914_v15, %v927_v45 }
 0x1cb   : > { %v937_v47 = vrot.slane %v930_v46, %v2051_v4 }
 0x1cd   : > { %v944_v16 = vrot.slane %v937_v47, %v2051_v4 }
 0x1cf   : > { %v946_v50 = vadd.f32 %v944_v16, %v901_v49 }
 0x1d1   : > { %947 = vst.msk [vmem:[#allocation6] sm:$0x3] %vm2055_vm4, %v946_v50 }
 0x27f   : > { %v771_v7 = vpop.f32.mrb[0].mxu0 }
 0x280   : > { %v1276_v52 = vadd.f32 -2.7182817, %v771_v7  ;;  %v773_v6 = vpop.f32.mrb[1].mxu0  ;;  %v835_v28 = vmul.f32 %v771_v7, %v1985_v19 }
 0x281   : > { %v1277_v26 = vadd.f32 -2.7182817, %v773_v6  ;;  %v775_v29 = vpop.f32.mrb[2].mxu0  ;;  %v836_v17 = vmul.f32 %v773_v6, %v1996_v18 }
 0x282   : > { %v964_v38 = vmul.f32 1.442695, %v1276_v52  ;;  %v837_v39 = vmul.f32 %v775_v29, %v1988_v48  ;;  %v1278_v53 = vadd.f32 -2.7182817, %v775_v29  ;;  %v777_v41 = vpop.f32.mrb[3].mxu0 }
 0x283   : > { %v966_v56 = vmul.f32 1.442695, %v1277_v26  ;;  %v838_v57 = vmul.f32 %v777_v41, %v1999_v55  ;;  %v1279_v59 = vadd.f32 -2.7182817, %v777_v41  ;;  %v791_v8 = vpop.f32.mrb[0].mxu1 }
 0x284   : > { %1457 = vpow2.f32 %v964_v38  ;;  %v851_v20 = vadd.f32 %v837_v39, %v835_v28  ;;  %v968_v62 = vmul.f32 1.442695, %v1278_v53  ;;  %v793_v63 = vpop.f32.mrb[1].mxu1  ;;  %v1284_v34 = vadd.f32 -2.7182817, %v791_v8 }
 0x285   : > { %1459 = vpow2.f32 %v966_v56  ;;  %v864_v33 = vadd.f32 %v838_v57, %v836_v17  ;;  %v970_v22 = vmul.f32 1.442695, %v1279_v59  ;;  %v795_v10 = vpop.f32.mrb[2].mxu1  ;;  %v843_v36 = vmul.f32 %v791_v8, %v2012_v21 }
 0x286   : > { %1461 = vpow2.f32 %v968_v62  ;;  %v1285_v37 = vadd.f32 -2.7182817, %v793_v63  ;;  %v797_v24 = vpop.f32.mrb[3].mxu1  ;;  %v980_v2 = vmul.f32 1.442695, %v1284_v34  ;;  %v844_v1 = vmul.f32 %v793_v63, %v2032_v11 }
 0x287   : > { %1463 = vpow2.f32 %v970_v22  ;;  %v1286_v13 = vadd.f32 -2.7182817, %v795_v10  ;;  %v781_v27 = vpop.f32.mrb[4].mxu0  ;;  %v1287_v30 = vadd.f32 -2.7182817, %v797_v24  ;;  %v845_v40 = vmul.f32 %v795_v10, %v2017_v60 }
 0x288   : > { %v982_v3 = vmul.f32 1.442695, %v1285_v37  ;;  %v839_v31 = vmul.f32 %v781_v27, %v1993_v54  ;;  %v1280_v12 = vadd.f32 -2.7182817, %v781_v27  ;;  %1465 = vpow2.f32 %v980_v2  ;;  %v783_v15 = vpop.f32.mrb[5].mxu0 }
 0x289   : > { %v984_v42 = vmul.f32 1.442695, %v1286_v13  ;;  %v846_v43 = vmul.f32 %v797_v24, %v2037_v35  ;;  %v986_v44 = vmul.f32 1.442695, %v1287_v30  ;;  %v785_v46 = vpop.f32.mrb[6].mxu0  ;;  %v840_v47 = vmul.f32 %v783_v15, %v2008_v9 }
 0x28a   : > { %1467 = vpow2.f32 %v982_v3  ;;  %v852_v5 = vadd.f32 %v851_v20, %v839_v31  ;;  %v972_v45 = vmul.f32 1.442695, %v1280_v12  ;;  %v1281_v49 = vadd.f32 -2.7182817, %v783_v15  ;;  %v787_v50 = vpop.f32.mrb[7].mxu0 }
 0x28b   : > { %1469 = vpow2.f32 %v984_v42  ;;  %v841_v16 = vmul.f32 %v785_v46, %v2005_v58  ;;  %v801_v7 = vpop.f32.mrb[4].mxu1  ;;  %v1282_v52 = vadd.f32 -2.7182817, %v785_v46  ;;  %v842_v6 = vmul.f32 %v787_v50, %v2020_v61 }
 0x28c   : > { %1471 = vpow2.f32 %v986_v44  ;;  %v1283_v26 = vadd.f32 -2.7182817, %v787_v50  ;;  %v803_v29 = vpop.f32.mrb[5].mxu1  ;;  %v865_v28 = vadd.f32 %v864_v33, %v840_v47  ;;  %v974_v38 = vmul.f32 1.442695, %v1281_v49 }
 0x28d   : > { %1473 = vpow2.f32 %v972_v45  ;;  %v853_v39 = vadd.f32 %v852_v5, %v841_v16  ;;  %v805_v53 = vpop.f32.mrb[6].mxu1  ;;  %v976_v17 = vmul.f32 1.442695, %v1282_v52  ;;  %v847_v57 = vmul.f32 %v801_v7, %v2025_v32 }
 0x28e   : > { %v1458_v41 = vpop.eup %1457  ;;  %v978_v56 = vmul.f32 1.442695, %v1283_v26  ;;  %v1288_v59 = vadd.f32 -2.7182817, %v801_v7  ;;  %1475 = vpow2.f32 %v974_v38  ;;  %v866_v62 = vadd.f32 %v865_v28, %v842_v6  ;;  %v807_v22 = vpop.f32.mrb[7].mxu1 }
 0x28f   : > { %v1460_v8 = vpop.eup %1459  ;;  %v854_v20 = vadd.f32 %v853_v39, %v843_v36  ;;  %v848_v63 = vmul.f32 %v803_v29, %v2041_v25  ;;  %1477 = vpow2.f32 %v976_v17  ;;  %v1289_v33 = vadd.f32 -2.7182817, %v803_v29 }
 0x290   : > { %v1462_v34 = vpop.eup %1461  ;;  %v988_v10 = vmul.f32 1.442695, %v1288_v59  ;;  %v849_v37 = vmul.f32 %v805_v53, %v2029_v23  ;;  %v867_v13 = vadd.f32 %v866_v62, %v844_v1  ;;  %1479 = vpow2.f32 %v978_v56 }
 0x291   : > { %v1464_v24 = vpop.eup %1463  ;;  %v1045_v2 = vadd.f32 %v1462_v34, %v1458_v41  ;;  %v855_v27 = vadd.f32 %v854_v20, %v845_v40  ;;  %v990_v30 = vmul.f32 1.442695, %v1289_v33  ;;  %v1290_v31 = vadd.f32 -2.7182817, %v805_v53 }
 0x292   : > { %v1058_v3 = vadd.f32 %v1464_v24, %v1460_v8  ;;  %1481 = vpow2.f32 %v988_v10  ;;  %v1466_v36 = vpop.eup %1465  ;;  %v868_v42 = vadd.f32 %v867_v13, %v846_v43  ;;  %v850_v15 = vmul.f32 %v807_v22, %v2045_v0 }
 0x293   : > { %v856_v12 = vadd.f32 %v855_v27, %v847_v57  ;;  %v1291_v44 = vadd.f32 -2.7182817, %v807_v22  ;;  %1483 = vpow2.f32 %v990_v30  ;;  %v992_v45 = vmul.f32 1.442695, %v1290_v31 }
 0x294   : > { %v1468_v5 = vpop.eup %1467  ;;  %v996_v46 = vadd.f32 %v1460_v8, %v1458_v41  ;;  %v999_v47 = vadd.f32 %v1464_v24, %v1462_v34  ;;  %v869_v16 = vadd.f32 %v868_v42, %v848_v63 }
 0x295   : > { %v1470_v49 = vpop.eup %1469  ;;  %v857_v1 = vadd.f32 %v856_v12, %v849_v37  ;;  %v994_v50 = vmul.f32 1.442695, %v1291_v44  ;;  %v1008_v40 = vadd.f32 %v1468_v5, %v1466_v36  ;;  %1485 = vpow2.f32 %v992_v45 }
 0x296   : > { %v1472_v7 = vpop.eup %1471  ;;  %997 = vadd.xlane.f32.xlu0 %v996_v46  ;;  %1000 = vadd.xlane.f32.xlu1 %v999_v47  ;;  %v870_v43 = vadd.f32 %v869_v16, %v850_v15 }
 0x297   : > { %v1474_v52 = vpop.eup %1473  ;;  %v858_v6 = vrot.slane %v857_v1, 4  ;;  %1487 = vpow2.f32 %v994_v50  ;;  %v1011_v26 = vadd.f32 %v1472_v7, %v1470_v49  ;;  %v813_v50 = vadd.f32 %v1999_v55, %v1988_v48 }
 0x298   : > { %v1046_v29 = vadd.f32 %v1474_v52, %v1045_v2  ;;  %v1476_v28 = vpop.eup %1475  ;;  %v871_v39 = vrot.slane %v870_v43, 4  ;;  %v822_v55 = vadd.f32 %v2032_v11, %v2012_v21  ;;  %v831_v21 = vadd.f32 %v2045_v0, %v2029_v23 }
 0x299   : > { %v859_v38 = vadd.f32 %v858_v6, %v857_v1  ;;  %v1478_v53 = vpop.eup %1477  ;;  %v1059_v41 = vadd.f32 %v1476_v28, %v1058_v3  ;;  %v1002_v17 = vadd.f32 %v1476_v28, %v1474_v52  ;;  %v834_v52 = vld [vmem:[#allocation7] sm:$0x3] }
 0x29a   : > { %v1480_v56 = vpop.eup %1479  ;;  %v1047_v57 = vadd.f32 %v1478_v53, %v1046_v29  ;;  %v872_v8 = vadd.f32 %v871_v39, %v870_v43  ;;  %v816_v43 = vadd.f32 %v2008_v9, %v1993_v54  ;;  %v825_v9 = vadd.f32 %v2037_v35, %v2017_v60 }
 0x29b   : > { %v860_v59 = vrot.slane %v859_v38, 2  ;;  %v1060_v62 = vadd.f32 %v1480_v56, %v1059_v41  ;;  %1003 = vadd.xlane.f32.xlu0 %v1002_v17  ;;  %v1005_v63 = vadd.f32 %v1480_v56, %v1478_v53  ;;  %v1044_v17 = vld [vmem:[#allocation5] sm:$0x3] }
 0x29c   : > { %v1482_v20 = vpop.eup %1481  ;;  %v1048_v22 = vadd.f32 %v1466_v36, %v1047_v57  ;;  %v873_v10 = vrot.slane %v872_v8, 2 }
 0x29d   : > { %v861_v34 = vadd.f32 %v860_v59, %v859_v38  ;;  %v1484_v33 = vpop.eup %1483  ;;  %v1061_v37 = vadd.f32 %v1468_v5, %v1060_v62  ;;  %1006 = vadd.xlane.f32.xlu1 %v1005_v63  ;;  %v810_v5 = vadd.f32 %v1996_v18, %v1985_v19  ;;  %v819_v18 = vadd.f32 %v2020_v61, %v2005_v58 }
 0x29e   : > { %v1049_v24 = vadd.f32 %v1470_v49, %v1048_v22  ;;  %v874_v13 = vadd.f32 %v873_v10, %v872_v8  ;;  %v1014_v27 = vadd.f32 %v1484_v33, %v1482_v20  ;;  %v828_v58 = vadd.f32 %v2041_v25, %v2025_v32 }
 0x29f   : > { %v862_v2 = vrot.slane %v861_v34, 1  ;;  %v1486_v3 = vpop.eup %1485  ;;  %v1062_v30 = vadd.f32 %v1472_v7, %v1061_v37  ;;  %1009 = vadd.xlane.f32.xlu0 %v1008_v40 }
 0x2a0   : > { %v1050_v12 = vadd.f32 %v1482_v20, %v1049_v24  ;;  %v875_v15 = vrot.slane %v874_v13, 1 }
 0x2a1   : > { %v1488_v31 = vpop.eup %1487  ;;  %v863_v42 = vadd.f32 %v862_v2, %v861_v34  ;;  %v1063_v44 = vadd.f32 %v1484_v33, %v1062_v30  ;;  %1012 = vadd.xlane.f32.xlu1 %v1011_v26 }
 0x2a2   : > { %v1017_v45 = vadd.f32 %v1488_v31, %v1486_v3  ;;  %v1051_v36 = vadd.f32 %v1486_v3, %v1050_v12  ;;  %v876_v46 = vadd.f32 %v875_v15, %v874_v13 }
 0x2a3   : > { %v1064_v47 = vadd.f32 %v1488_v31, %v1063_v44  ;;  %1015 = vadd.xlane.f32.xlu0 %v1014_v27 }
 0x2a4   : > { %v1052_v49 = vrot.slane %v1051_v36, 4  ;;  %v879_v16 = vcombine.low %v863_v42, %v876_v46 }
 0x2a5   : > { %v1065_v1 = vrot.slane %v1064_v47, 4  ;;  %1018 = vadd.xlane.f32.xlu1 %v1017_v45 }
 0x2a6   : > { %v1053_v40 = vadd.f32 %v1052_v49, %v1051_v36  ;;  %v886_v7 = vrot.slane %v879_v16, %v2051_v4 }
 0x2a7   : > { %v1066_v6 = vadd.f32 %v1065_v1, %v1064_v47  ;;  %811 = vadd.xlane.f32.xlu0 %v810_v5 }
 0x2a8   : > { %v1054_v26 = vrot.slane %v1053_v40, 2  ;;  %v893_v29 = vrot.slane %v886_v7, %v2051_v4 }
 0x2a9   : > { %v1067_v19 = vrot.slane %v1066_v6, 2  ;;  %814 = vadd.xlane.f32.xlu1 %v813_v50 }
 0x2aa   : > { %v1055_v28 = vadd.f32 %v1054_v26, %v1053_v40  ;;  %v895_v38 = vadd.f32 %v893_v29, %v834_v52 }
 0x2ab   : > { %v1068_v48 = vadd.f32 %v1067_v19, %v1066_v6  ;;  %817 = vadd.xlane.f32.xlu0 %v816_v43 }
 0x2ac   : > { %v1056_v39 = vrot.slane %v1055_v28, 1  ;;  %900 = vst.msk [vmem:[#allocation7] sm:$0x3] %vm2055_vm4, %v895_v38 }
 0x2ad   : > { %v1069_v54 = vrot.slane %v1068_v48, 1  ;;  %820 = vadd.xlane.f32.xlu1 %v819_v18 }
 0x2ae   : > { %v1057_v53 = vadd.f32 %v1056_v39, %v1055_v28 }
 0x2af   : > { %v1070_v41 = vadd.f32 %v1069_v54, %v1068_v48  ;;  %823 = vadd.xlane.f32.xlu0 %v822_v55 }
 0x2b1   : > { %v1073_v61 = vcombine.low %v1057_v53, %v1070_v41  ;;  %826 = vadd.xlane.f32.xlu1 %v825_v9 }
 0x2b3   : > { %v1080_v11 = vrot.slane %v1073_v61, %v2051_v4  ;;  %829 = vadd.xlane.f32.xlu0 %v828_v58 }
 0x2b5   : > { %v1087_v56 = vrot.slane %v1080_v11, %v2051_v4  ;;  %832 = vadd.xlane.f32.xlu1 %v831_v21 }
 0x2b7   : > { %v1089_v57 = vadd.f32 %v1087_v56, %v1044_v17 }
 0x2b9   : > { %1090 = vst.msk [vmem:[#allocation5] sm:$0x3] %vm2055_vm4, %v1089_v57 }
 0x323   : > { %v998_v60 = vpop.xlane.xlu0 %997  ;;  %v1001_v35 = vpop.xlane.xlu1 %1000 }
 0x324   : > { %1489 = vlog2.f32 %v998_v60 }
 0x325   : > { %1491 = vlog2.f32 %v1001_v35 }
 0x328   : > { %v1004_v32 = vpop.xlane.xlu0 %1003 }
 0x329   : > { %1493 = vlog2.f32 %v1004_v32 }
 0x32a   : > { %v1007_v25 = vpop.xlane.xlu1 %1006 }
 0x32b   : > { %1495 = vlog2.f32 %v1007_v25 }
 0x32c   : > { %v1010_v23 = vpop.xlane.xlu0 %1009 }
 0x32d   : > { %1497 = vlog2.f32 %v1010_v23 }
 0x32e   : > { %v1490_v0 = vpop.eup %1489  ;;  %v1013_v8 = vpop.xlane.xlu1 %1012 }
 0x32f   : > { %v1492_v59 = vpop.eup %1491  ;;  %1499 = vlog2.f32 %v1013_v8  ;;  %v1021_v4 = vmul.f32 0.6931472, %v1490_v0  ;;  %v1091_v8 = vld [vmem:[#allocation8] sm:$0x1] }
 0x330   : > { %v1016_v20 = vpop.xlane.xlu0 %1015  ;;  %v1023_v62 = vmul.f32 0.6931472, %v1492_v59 }
 0x331   : > { %1501 = vlog2.f32 %v1016_v20  ;;  %v1036_v22 = vadd.f32 2.7182817, %v1021_v4 }
 0x332   : > { %v1019_v51 = vpop.xlane.xlu1 %1018  ;;  %v1037_v24 = vadd.f32 2.7182817, %v1023_v62  ;;  %v1133_v62 = vld [vmem:[#allocation5] sm:$0x3] (!%p1292_p5) }
 0x333   : > { %v1494_v63 = vpop.eup %1493  ;;  %1503 = vlog2.f32 %v1019_v51 }
 0x334   : > { %v812_v34 = vpop.xlane.xlu0 %811  ;;  %v1025_v10 = vmul.f32 0.6931472, %v1494_v63  ;;  %1505 = vlog2.f32 (!%p1292_p5), %v1133_v62 }
 0x335   : > { %v1496_v33 = vpop.eup %1495  ;;  %v1092_v37 = vmul.f32 %v1036_v22, %v812_v34  ;;  %v1137_v22 = vld [vmem:[#allocation6] sm:$0x3] (!%p1292_p5)  ;;  %v1163_v34 = vld [vmem:[#allocation7] sm:$0x3] (!%p1292_p5) }
 0x336   : > { %v815_v2 = vpop.xlane.xlu1 %814  ;;  %v1038_v13 = vadd.f32 2.7182817, %v1025_v10  ;;  %v1027_v27 = vmul.f32 0.6931472, %v1496_v33  ;;  %v1142_v33 = vsub.s32 (!%p1292_p5), 0, %v2048_v14 }
 0x337   : > { %v1498_v3 = vpop.eup %1497  ;;  %v1093_v30 = vmul.f32 %v1037_v24, %v815_v2  ;;  %v1101_v44 = vsel %vm1100_vm5, %v1092_v37, 0.0  ;;  %v1146_v37 = vsub.s32 (!%p1292_p5), 1, %v2048_v14 }
 0x338   : > { %v818_v31 = vpop.xlane.xlu0 %817  ;;  %v1039_v12 = vadd.f32 2.7182817, %v1027_v27  ;;  %v1029_v42 = vmul.f32 0.6931472, %v1498_v3  ;;  %v1168_v2 = vrot.slane (!%p1292_p5), %v1163_v34, %v1142_v33 }
 0x339   : > { %v1500_v15 = vpop.eup %1499  ;;  %v1102_v45 = vsel %vm1100_vm5, %v1093_v30, 0.0  ;;  %v1094_v36 = vmul.f32 %v1038_v13, %v818_v31  ;;  %v1172_v13 = vrot.slane (!%p1292_p5), %v1163_v34, %v1146_v37 }
 0x33a   : > { %v1103_v46 = vadd.f32 %v1102_v45, %v1101_v44  ;;  %v821_v47 = vpop.xlane.xlu1 %820  ;;  %v1040_v5 = vadd.f32 2.7182817, %v1029_v42  ;;  %v1031_v49 = vmul.f32 0.6931472, %v1500_v15 }
 0x33b   : > { %v1502_v16 = vpop.eup %1501  ;;  %v1104_v1 = vsel %vm1100_vm5, %v1094_v36, 0.0  ;;  %v1095_v50 = vmul.f32 %v1039_v12, %v821_v47  ;;  %v1175_v12 = vsel (!%p1292_p5), %vm1150_vm7, %v1168_v2, 0.0  ;;  %v1176_v42 = vsel (!%p1292_p5), %vm1150_vm7, %v1172_v13, 0.0 }
 0x33c   : > { %v1105_v40 = vadd.f32 %v1104_v1, %v1103_v46  ;;  %v824_v7 = vpop.xlane.xlu0 %823  ;;  %v1041_v52 = vadd.f32 2.7182817, %v1031_v49  ;;  %v1033_v6 = vmul.f32 0.6931472, %v1502_v16  ;;  %v1177_v44 = vadd.f32 (!%p1292_p5), %v1176_v42, %v1175_v12 }
 0x33d   : > { %v1504_v43 = vpop.eup %1503  ;;  %v1106_v26 = vsel %vm1100_vm5, %v1095_v50, 0.0  ;;  %v1096_v29 = vmul.f32 %v1040_v5, %v824_v7 }
 0x33e   : > { %v1107_v19 = vadd.f32 %v1106_v26, %v1105_v40  ;;  %v827_v18 = vpop.xlane.xlu1 %826  ;;  %v1042_v28 = vadd.f32 2.7182817, %v1033_v6  ;;  %v1035_v38 = vmul.f32 0.6931472, %v1504_v43  ;;  %v1506_v51 = vpop.eup (!%p1292_p5), %1505 }
 0x33f   : > { %v1108_v48 = vsel %vm1100_vm5, %v1096_v29, 0.0  ;;  %v1097_v55 = vmul.f32 %v1041_v52, %v827_v18  ;;  %v1135_v63 = vmul.f32 (!%p1292_p5), 0.6931472, %v1506_v51 }
 0x340   : > { %v1109_v39 = vadd.f32 %v1108_v48, %v1107_v19  ;;  %v830_v54 = vpop.xlane.xlu0 %829  ;;  %v1043_v9 = vadd.f32 2.7182817, %v1035_v38 }
 0x341   : > { %v1110_v53 = vsel %vm1100_vm5, %v1097_v55, 0.0  ;;  %v1098_v41 = vmul.f32 %v1042_v28, %v830_v54  ;;  %v1136_v10 = vadd.f32 (!%p1292_p5), 2.7182817, %v1135_v63 }
 0x342   : > { %v1111_v58 = vadd.f32 %v1110_v53, %v1109_v39  ;;  %v833_v61 = vpop.xlane.xlu1 %832 }
 0x343   : > { %v1112_v21 = vsel %vm1100_vm5, %v1098_v41, 0.0  ;;  %v1099_v11 = vmul.f32 %v1043_v9, %v833_v61  ;;  %v1138_v24 = vmul.f32 (!%p1292_p5), %v1137_v22, %v1136_v10 }
 0x344   : > { %v1113_v17 = vadd.f32 %v1112_v21, %v1111_v58 }
 0x345   : > { %v1114_v56 = vsel %vm1100_vm5, %v1099_v11, 0.0  ;;  %v1143_v27 = vrot.slane (!%p1292_p5), %v1138_v24, %v1142_v33  ;;  %v1147_v3 = vrot.slane (!%p1292_p5), %v1138_v24, %v1146_v37 }
 0x346   : > { %v1115_v57 = vadd.f32 %v1114_v56, %v1113_v17 }
 0x347   : > { %v1151_v30 = vsel (!%p1292_p5), %vm1150_vm7, %v1143_v27, 0.0  ;;  %v1152_v31 = vsel (!%p1292_p5), %vm1150_vm7, %v1147_v3, 0.0 }
 0x348   : > { %1116 = vadd.xlane.f32.xlu0 %v1115_v57  ;;  %v1153_v15 = vadd.f32 (!%p1292_p5), %v1152_v31, %v1151_v30 }
 0x34c   : > { %1154 = vadd.xlane.f32.xlu0 (!%p1292_p5), %v1153_v15 }
 0x350   : > { %1178 = vadd.xlane.f32.xlu0 (!%p1292_p5), %v1177_v44 }
 0x3d5   : > { %v1117_v60 = vpop.xlane.xlu0 %1116 }
 0x3d6   : > { %v1118_v35 = vrot.slane %v1117_v60, 4 }
 0x3d8   : > { %v1119_v32 = vadd.f32 %v1118_v35, %v1117_v60 }
 0x3d9   : > { %v1155_v45 = vpop.xlane.xlu0 (!%p1292_p5), %1154 }
 0x3da   : > { %v1120_v25 = vrot.slane %v1119_v32, 2  ;;  %v1156_v36 = vrot.slane (!%p1292_p5), %v1155_v45, 4 }
 0x3dc   : > { %v1121_v23 = vadd.f32 %v1120_v25, %v1119_v32  ;;  %v1157_v46 = vadd.f32 (!%p1292_p5), %v1156_v36, %v1155_v45 }
 0x3dd   : > { %v1179_v47 = vpop.xlane.xlu0 (!%p1292_p5), %1178 }
 0x3de   : > { %v1122_v0 = vrot.slane %v1121_v23, 1  ;;  %v1158_v5 = vrot.slane (!%p1292_p5), %v1157_v46, 2  ;;  %v1180_v14 = vrot.slane (!%p1292_p5), %v1179_v47, 4 }
 0x3e0   : > { %v1123_v59 = vadd.f32 %v1122_v0, %v1121_v23  ;;  %v1181_v49 = vadd.f32 (!%p1292_p5), %v1180_v14, %v1179_v47  ;;  %v1159_v16 = vadd.f32 (!%p1292_p5), %v1158_v5, %v1157_v46 }
 0x3e2   : > { %1354 = vpush %v1123_v59  ;;  %v1182_v1 = vrot.slane (!%p1292_p5), %v1181_v49, 2  ;;  %v1160_v50 = vrot.slane (!%p1292_p5), %v1159_v16, 1 }
 0x3e4   : > { %v1183_v40 = vadd.f32 (!%p1292_p5), %v1182_v1, %v1181_v49  ;;  %v1161_v7 = vadd.f32 (!%p1292_p5), %v1160_v50, %v1159_v16 }
 0x3e6   : > { %1356 = vpush (!%p1292_p5), %v1161_v7  ;;  %v1184_v52 = vrot.slane (!%p1292_p5), %v1183_v40, 1 }
 0x3e8   : > { %v1185_v6 = vadd.f32 (!%p1292_p5), %v1184_v52, %v1183_v40 }
 0x3ea   : > { %1358 = vpush (!%p1292_p5), %v1185_v6 }
 0x411   : > { %1132 = sbr.rel (%p1292_p5) target bundleno = 1064 (0x428), region = 71 }
 0x413   : > { %s1355_s19 = spop %1354 }
 0x414   : > { %v1125_v4 = vstv %s1355_s19 }
 0x415   : > { %v1126_v20 = vadd.f32 %v1125_v4, %v1091_v8 }
 0x417   : > { %1128 = vst.msk [vmem:[#allocation8] sm:$0x1] %vm1127_vm6, %v1126_v20  ;;  %s1357_s22 = spop (!%p1292_p5), %1356 }
 0x418   : > { %v1191_v19 = vstv %s1357_s22 }
 0x41b   : > { %s1359_s16 = spop %1358 }
 0x41c   : > { %s1187_s17 = smul.f32 2.0, %s1359_s16 }
 0x41e   : > { %v1188_v43 = vld [vmem:[#allocation8] sm:$0x1]  ;;  %v1189_v26 = vstv %s1187_s17 }
 0x41f   : > { %v1190_v29 = vsub.f32 %v1189_v26, %v1188_v43 }
 0x421   : > { %v1192_v18 = vsub.f32 %v1190_v29, %v1191_v19 }
 0x423   : > { %v1193_v28 = vsub.f32 0.0, %v1192_v18 }
 0x425   : > { %v1194_v38 = vmul.f32 0.001953125, %v1193_v28 }
 0x427   : > { %1195 = vst.msk [vmem:[#allocation9] sm:$0x1] %vm1127_vm6, %v1194_v38 }
 0x428 PF: > { %p1364_p6 = scmp.eq.s32.totalorder %s1576_s13, 3  ;;  %s1549_s18 = smov [#allocation9]  }
 0x429   : > { %s1203_s20 = sshll.u32 %s1549_s18, 4  ;;  %s1204_s20 = int_to_ptr.vmem [resolvable:$true] %s1203_s20 }
 0x42a   : > { %s1507_s21 = scalar_lea.vmem %s1204_s20, 16  ;;  %s1513_s23 = scalar_lea.vmem %s1204_s20, 32 }
 0x42b   : > { %p1508_p7 = scmp.ne.s32.totalorder %s1204_s20, %s1507_s21  ;;  %p1514_p10 = scmp.lt.s32.totalorder %s1204_s20, %s1204_s20 }
 0x42c   : > { %p1515_p11 = scmp.lt.s32.totalorder %s1513_s23, %s1507_s21 }
 0x42d   : > { %p1509_p8 = pnand %p1508_p7, %p1364_p6 }
 0x42e   : > { %p1516_p12 = por %p1515_p11, %p1514_p10 }
 0x42f   : > { %p1510_p9 = pneg %p1509_p8 }
 0x431   : > { %p1517_p13 = pnand %p1516_p12, %p1510_p9 }
 0x433   : > { %1520 = shalt.err (!%p1517_p13)
}
 0x434   : > { %s1521_s26 = scalar_lea.hbm %s2143_s3, 16 }
 0x435   : > { %p1522_p0 = scmp.ne.s32.totalorder %s2143_s3, %s1521_s26  ;;  %p1527_p3 = scmp.lt.u32.totalorder %s1521_s26, %s2143_s3 }
 0x437   : > { %p1523_p1 = pnand %p1522_p0, %p1364_p6 }
 0x439   : > { %p1524_p2 = pneg %p1523_p1 }
 0x43b   : > { %p1529_p4 = pnand %p1527_p3, %p1524_p2 }
 0x43d   : > { %1532 = shalt.err (!%p1529_p4)
}
 0x43e   : > { %1361 = dma.vmem_to_hbm [thread:$0]  (%p1364_p6), %s1204_s20, 16, %s2143_s3, [#allocation10]  }
 0x43f   : > { %1540 = dma.done.wait (%p1364_p6), [#allocation10], 16  }
 0x440   : > { %1542 = vsyncadd (%p1364_p6), [#allocation10], 4294967280 }
 0x441 PF: > { %s14_s12 = sadd.s32 1, %s1545_s12  }
 0x442   : > { %p11_p5 = scmp.ge.s32.totalorder %s14_s12, 6  }
 0x444   :  { %13 = sbr.rel (!%p11_p5) target bundleno = 1 (0x1), region = 109 }
 0x44b   :  { %1216 = vsyncpa [#allocation10], 1 }
 0x44c   :  { %1218 = vsyncpa [#allocation10 + $0x1], 1 }

</bundles_post_ra>
